<compile_context>
chip_gen: v6e
topology: v6e:2x2x1
jax: 0.10.0
libtpu: 0.0.40
codegen_flags: <defaults>
</compile_context>

<pallas_src>
import jax
import jax.numpy as jnp
from jax.experimental import pallas as pl
from jax.experimental.pallas import tpu as pltpu

NUM_HEADS = 8   # torch_geometric EGConv defaults
NUM_BASES = 4


def _round_up(n, m):
    return ((n + m - 1) // m) * m


def _full_spec(shape):
    return pl.BlockSpec(shape, lambda i, _nd=len(shape): (0,) * _nd)


# ----------------------------------------------------------------------------
# fully fused forward kernel
# ----------------------------------------------------------------------------
def _make_model_kernel(n_conv, n_mlp, n_pred, heads, n_bases, chans):
    hc = heads * chans            # per-layer EGConv output width (H*C)
    bhc = n_bases * hc            # replicated width (B*H*C) = 128 lanes here

    def kernel(*refs):
        it = iter(refs)
        h = next(it)[...]                      # (Np, in)    bf16
        adj = next(it)[...]                    # (Np, Np)    bf16  symnorm Â
        conv = [(next(it)[...], next(it)[...], next(it)[...])
                for _ in range(n_conv)]        # (w_cat, b_comb, bias) per layer
        gcn_w = next(it)[...]                  # (hid, gcn_out) bf16
        gcn_b = next(it)[...]                  # (1, gcn_out)   f32
        pool = next(it)[...]                   # (Gp, Np)    bf16  mean-pool
        mol = next(it)[...]                    # (Gp, mlp_in) bf16
        mlp = [(next(it)[...], next(it)[...]) for _ in range(n_mlp)]
        pred = [(next(it)[...], next(it)[...]) for _ in range(n_pred)]
        out_w = next(it)[...]                  # (hid, 128) bf16, zero-padded cols
        out_b = next(it)[...]                  # (1, 128)   f32
        o_ref = next(it)

        # ------------- EGConv stack (symnorm aggregator) -------------
        for w_cat, b_comb, bias in conv:
            # merged (replicated bases || replicated weightings) projection:
            # one MXU pass, 256 output lanes.
            xw = jnp.dot(h, w_cat, preferred_element_type=jnp.float32)
            bases_rep = xw[:, :bhc].astype(jnp.bfloat16)    # (Np, B*H*C)
            weight_rep = xw[:, bhc:] + b_comb               # (Np, B*H*C) f32

            # symnorm propagation: Â @ bases  (bf16 MXU operands, f32 accum)
            agg_rep = jnp.dot(adj, bases_rep,
                              preferred_element_type=jnp.float32)

            # lane-dense per-head combine: full-width vmul, then reduce over
            # the `bases` axis with lane-rolls by H*C (columns are ordered
            # [b][h][c], so the valid result is the first H*C lanes).
            prod = agg_rep * weight_rep
            red = prod
            for j in range(1, n_bases):
                red = red + pltpu.roll(prod, j * hc, axis=1)
            h = (red[:, :hc] + bias).astype(jnp.bfloat16)   # next-layer input

        # ------------- GCN tail: relu(Linear) + global mean pool -------------
        g = jnp.maximum(
            jnp.dot(h, gcn_w, preferred_element_type=jnp.float32) + gcn_b, 0.0)
        g = jnp.dot(pool, g.astype(jnp.bfloat16),
                    preferred_element_type=jnp.float32)      # (Gp, gcn_out)

        # ------------- MLP branch (relu after every linear, incl. output) ----
        m = mol
        for w, b in mlp:
            m = jnp.maximum(
                jnp.dot(m, w, preferred_element_type=jnp.float32) + b, 0.0)
            m = m.astype(jnp.bfloat16)

        hcat = jnp.concatenate([g.astype(jnp.bfloat16), m], axis=1)

        # ------------- predictor stack + lane-padded output linear -----------
        hp = hcat
        for w, b in pred:
            hp = jnp.maximum(
                jnp.dot(hp, w, preferred_element_type=jnp.float32) + b, 0.0)
            hp = hp.astype(jnp.bfloat16)
        o_ref[...] = jnp.dot(hp, out_w,
                             preferred_element_type=jnp.float32) + out_b

    return kernel


def egconv_model_forward(packed, x, adj_hat, pool_mat, mol_features):
    """Single pallas_call for the whole EGConvModel forward."""
    inputs = [x, adj_hat]
    for layer in packed["gcn_convs"]:
        inputs += [layer["w_cat"], layer["b_comb"], layer["bias"]]
    inputs += [packed["gcn_out_w"], packed["gcn_out_b"], pool_mat, mol_features]
    for w, b in packed["mlp"]:
        inputs += [w, b]
    for w, b in packed["predictor"]:
        inputs += [w, b]
    inputs += [packed["out_w"], packed["out_b"]]

    g_pad = pool_mat.shape[0]
    out_lanes = packed["out_w"].shape[1]
    chans = packed["gcn_convs"][0]["bias"].shape[1] // NUM_HEADS

    kernel = _make_model_kernel(
        n_conv=len(packed["gcn_convs"]), n_mlp=len(packed["mlp"]),
        n_pred=len(packed["predictor"]), heads=NUM_HEADS, n_bases=NUM_BASES,
        chans=chans)

    return pl.pallas_call(
        kernel,
        grid=(1,),
        in_specs=[_full_spec(a.shape) for a in inputs],
        out_specs=_full_spec((g_pad, out_lanes)),
        out_shape=jax.ShapeDtypeStruct((g_pad, out_lanes), jnp.float32),
        compiler_params=pltpu.CompilerParams(
            dimension_semantics=("arbitrary",)),
    )(*inputs)


# ----------------------------------------------------------------------------
# glue: dense symnorm adjacency and mean-pool matrix (plain JAX, built once
# per batch, outside the jitted forward).
# ----------------------------------------------------------------------------
def symnorm_adj(edge_index, num_nodes):
    src, dst = edge_index[0], edge_index[1]
    a = jnp.zeros((num_nodes, num_nodes), jnp.float32)
    a = a.at[dst, src].add(1.0)                       # message j -> i at row i
    a = a + jnp.eye(num_nodes, dtype=jnp.float32)     # add self loops
    deg = a.sum(axis=1)
    dinv = jnp.where(deg > 0, 1.0 / jnp.sqrt(deg), 0.0)
    return dinv[:, None] * a * dinv[None, :]


def mean_pool_matrix(batch_index, num_graphs):
    onehot = (batch_index[None, :] == jnp.arange(num_graphs)[:, None])
    onehot = onehot.astype(jnp.float32)
    counts = onehot.sum(axis=1, keepdims=True)
    return onehot / jnp.maximum(counts, 1.0)          # (G, N)


# ----------------------------------------------------------------------------
# parameter init (deterministic, synthetic; matches PyG/torch shapes) + the
# one-time host-side packing (column replication to [b][h][c] order, bf16
# casts, lane-dense output head).
# ----------------------------------------------------------------------------
def _uniform(key, shape, bound):
    return jax.random.uniform(key, shape, jnp.float32, -bound, bound)


def init_linear(key, fan_in, fan_out):
    k1, k2 = jax.random.split(key)
    bound = 1.0 / float(jnp.sqrt(fan_in))
    return _uniform(k1, (fan_in, fan_out), bound), _uniform(k2, (fan_out,), bound)


def init_egconv(key, in_ch, out_ch):
    assert out_ch % NUM_HEADS == 0
    c = out_ch // NUM_HEADS
    k1, k2 = jax.random.split(key)
    glorot = float(jnp.sqrt(6.0 / (in_ch + NUM_BASES * c)))
    w_bases = _uniform(k1, (in_ch, NUM_BASES * c), glorot)           # no bias
    w_comb, b_comb = init_linear(k2, in_ch, NUM_HEADS * NUM_BASES)
    return {"w_bases": w_bases, "w_comb": w_comb, "b_comb": b_comb,
            "bias": jnp.zeros((out_ch,), jnp.float32)}               # PyG default


def init_params(key, cfg):
    keys = iter(jax.random.split(key, 32))
    p = {"gcn_convs": [], "mlp": [], "predictor": []}
    p["gcn_convs"].append(init_egconv(next(keys), cfg["n_gcn_inputs"], cfg["n_gcn_hiddens"]))
    for _ in range(1, cfg["n_gcn_layers"]):
        p["gcn_convs"].append(init_egconv(next(keys), cfg["n_gcn_hiddens"], cfg["n_gcn_hiddens"]))
    p["gcn_out_w"], p["gcn_out_b"] = init_linear(next(keys), cfg["n_gcn_hiddens"], cfg["n_gcn_outputs"])
    p["mlp"].append(init_linear(next(keys), cfg["n_mlp_inputs"], cfg["n_mlp_hiddens"]))
    for _ in range(1, cfg["n_mlp_layers"]):
        p["mlp"].append(init_linear(next(keys), cfg["n_mlp_hiddens"], cfg["n_mlp_hiddens"]))
    p["mlp"].append(init_linear(next(keys), cfg["n_mlp_hiddens"], cfg["n_mlp_outputs"]))
    cat_dim = cfg["n_gcn_outputs"] + cfg["n_mlp_outputs"]
    p["predictor"].append(init_linear(next(keys), cat_dim, cfg["n_predictor_hiddens"]))
    for _ in range(1, cfg["n_predictor_layers"]):
        p["predictor"].append(init_linear(next(keys), cfg["n_predictor_hiddens"], cfg["n_predictor_hiddens"]))
    p["out_w"], p["out_b"] = init_linear(next(keys), cfg["n_predictor_hiddens"], 1)
    return p


def pack_params(p, cfg, out_lanes=128):
    """One-time host-side packing into kernel-ready, bf16, lane-dense arrays."""
    heads, n_bases = NUM_HEADS, NUM_BASES
    chans = cfg["n_gcn_hiddens"] // heads
    hc, bhc = heads * chans, n_bases * heads * chans

    packed = {"gcn_convs": [], "mlp": [], "predictor": []}
    for layer in p["gcn_convs"]:
        in_ch = layer["w_bases"].shape[0]
        # bases weights (in, B*C) replicated over heads -> [b][h][c] columns
        wb = jnp.broadcast_to(
            layer["w_bases"].reshape(in_ch, n_bases, 1, chans),
            (in_ch, n_bases, heads, chans)).reshape(in_ch, bhc)
        # combine weights (in, H*B) permuted to [b][h] and replicated over c
        wc = jnp.broadcast_to(
            layer["w_comb"].reshape(in_ch, heads, n_bases)
            .transpose(0, 2, 1)[..., None],
            (in_ch, n_bases, heads, chans)).reshape(in_ch, bhc)
        bc = jnp.broadcast_to(
            layer["b_comb"].reshape(heads, n_bases).T[..., None],
            (n_bases, heads, chans)).reshape(1, bhc)
        packed["gcn_convs"].append({
            "w_cat": jnp.concatenate([wb, wc], axis=1).astype(jnp.bfloat16),
            "b_comb": bc.astype(jnp.float32),
            "bias": layer["bias"].reshape(1, hc).astype(jnp.float32),
        })
    packed["gcn_out_w"] = p["gcn_out_w"].astype(jnp.bfloat16)
    packed["gcn_out_b"] = p["gcn_out_b"].reshape(1, -1).astype(jnp.float32)
    packed["mlp"] = [(w.astype(jnp.bfloat16), b.reshape(1, -1).astype(jnp.float32))
                     for w, b in p["mlp"]]
    packed["predictor"] = [(w.astype(jnp.bfloat16), b.reshape(1, -1).astype(jnp.float32))
                           for w, b in p["predictor"]]
    # lane-dense output head: zero-pad the 1-wide linear to `out_lanes` cols
    hid = p["out_w"].shape[0]
    ow = jnp.zeros((hid, out_lanes), jnp.float32).at[:, :1].set(p["out_w"])
    ob = jnp.zeros((1, out_lanes), jnp.float32).at[:, :1].set(p["out_b"].reshape(1, 1))
    packed["out_w"] = ow.astype(jnp.bfloat16)
    packed["out_b"] = ob
    return packed


# ----------------------------------------------------------------------------
if __name__ == "__main__":
    cfg = dict(
        n_gcn_inputs=16, n_gcn_hiddens=32, n_gcn_layers=2, n_gcn_outputs=8,
        n_mlp_inputs=16, n_mlp_hiddens=32, n_mlp_layers=2, n_mlp_outputs=8,
        n_predictor_hiddens=32, n_predictor_layers=2,
    )

    key = jax.random.PRNGKey(0)
    k_params, k_x, k_mol = jax.random.split(key, 3)
    params = init_params(k_params, cfg)
    packed = pack_params(params, cfg)

    # Two graphs of 6 nodes each, each a bidirectional ring.
    num_nodes, num_graphs = 12, 2

    def ring_edges(offset, n):
        src = jnp.arange(n) + offset
        dst = (jnp.arange(n) + 1) % n + offset
        return jnp.concatenate(
            [jnp.stack([src, dst]), jnp.stack([dst, src])], axis=1)

    edge_index = jnp.concatenate([ring_edges(0, 6), ring_edges(6, 6)], axis=1)  # (2, 24)
    batch_index = jnp.array([0] * 6 + [1] * 6, dtype=jnp.int32)                 # (12,)

    x = jax.random.normal(k_x, (num_nodes, cfg["n_gcn_inputs"]), jnp.float32)
    mol_features = jax.random.normal(k_mol, (num_graphs, cfg["n_mlp_inputs"]), jnp.float32)

    adj_hat = symnorm_adj(edge_index, num_nodes)          # (N, N) dense symnorm Â
    pool_mat = mean_pool_matrix(batch_index, num_graphs)  # (G, N)

    # Pad the node axis to 128 (lane-dense Â, full unmasked K for the
    # propagation matmul) and the graph axis to 8 sublanes.  Padded rows
    # carry zero adjacency / pooling weight, so the result is unchanged.
    n_pad = _round_up(num_nodes, 128)
    g_pad = _round_up(num_graphs, 8)
    x_p = jnp.pad(x, ((0, n_pad - num_nodes), (0, 0))).astype(jnp.bfloat16)
    adj_p = jnp.pad(adj_hat, ((0, n_pad - num_nodes),
                              (0, n_pad - num_nodes))).astype(jnp.bfloat16)
    pool_p = jnp.pad(pool_mat, ((0, g_pad - num_graphs),
                                (0, n_pad - num_nodes))).astype(jnp.bfloat16)
    mol_p = jnp.pad(mol_features, ((0, g_pad - num_graphs), (0, 0))).astype(jnp.bfloat16)

    fwd = jax.jit(egconv_model_forward)
    out_full = jax.block_until_ready(fwd(packed, x_p, adj_p, pool_p, mol_p))
    out = out_full[:num_graphs, :1]                       # strip lane/graph padding
    assert out.shape == (num_graphs, 1)
    assert bool(jnp.all(jnp.isfinite(out)))
    print("KERNEL_OK")
</pallas_src>

<mosaic_0001>
module attributes {stable_mosaic.version = 11 : i64} {
  func.func @kernel(%arg0: i32, %arg1: memref<128x16xbf16, #tpu.memory_space<vmem>>, %arg2: memref<128x128xbf16, #tpu.memory_space<vmem>>, %arg3: memref<16x256xbf16, #tpu.memory_space<vmem>>, %arg4: memref<1x128xf32, #tpu.memory_space<vmem>>, %arg5: memref<1x32xf32, #tpu.memory_space<vmem>>, %arg6: memref<32x256xbf16, #tpu.memory_space<vmem>>, %arg7: memref<1x128xf32, #tpu.memory_space<vmem>>, %arg8: memref<1x32xf32, #tpu.memory_space<vmem>>, %arg9: memref<32x8xbf16, #tpu.memory_space<vmem>>, %arg10: memref<1x8xf32, #tpu.memory_space<vmem>>, %arg11: memref<8x128xbf16, #tpu.memory_space<vmem>>, %arg12: memref<8x16xbf16, #tpu.memory_space<vmem>>, %arg13: memref<16x32xbf16, #tpu.memory_space<vmem>>, %arg14: memref<1x32xf32, #tpu.memory_space<vmem>>, %arg15: memref<32x32xbf16, #tpu.memory_space<vmem>>, %arg16: memref<1x32xf32, #tpu.memory_space<vmem>>, %arg17: memref<32x8xbf16, #tpu.memory_space<vmem>>, %arg18: memref<1x8xf32, #tpu.memory_space<vmem>>, %arg19: memref<16x32xbf16, #tpu.memory_space<vmem>>, %arg20: memref<1x32xf32, #tpu.memory_space<vmem>>, %arg21: memref<32x32xbf16, #tpu.memory_space<vmem>>, %arg22: memref<1x32xf32, #tpu.memory_space<vmem>>, %arg23: memref<32x128xbf16, #tpu.memory_space<vmem>>, %arg24: memref<1x128xf32, #tpu.memory_space<vmem>>, %arg25: memref<8x128xf32, #tpu.memory_space<vmem>>) attributes {dimension_semantics = [#tpu.dimension_semantics<arbitrary>], iteration_bounds = array<i64: 1>, scalar_prefetch = 0 : i64, scratch_operands = 0 : i64, tpu.core_type = #tpu.core_type<tc>, window_params = [{pipeline_mode = #tpu.pipeline_mode<synchronous>, transform_indices = @transform_0, window_bounds = array<i64: 128, 16>}, {pipeline_mode = #tpu.pipeline_mode<synchronous>, transform_indices = @transform_1, window_bounds = array<i64: 128, 128>}, {pipeline_mode = #tpu.pipeline_mode<synchronous>, transform_indices = @transform_2, window_bounds = array<i64: 16, 256>}, {pipeline_mode = #tpu.pipeline_mode<synchronous>, transform_indices = @transform_3, window_bounds = array<i64: 1, 128>}, {pipeline_mode = #tpu.pipeline_mode<synchronous>, transform_indices = @transform_4, window_bounds = array<i64: 1, 32>}, {pipeline_mode = #tpu.pipeline_mode<synchronous>, transform_indices = @transform_5, window_bounds = array<i64: 32, 256>}, {pipeline_mode = #tpu.pipeline_mode<synchronous>, transform_indices = @transform_6, window_bounds = array<i64: 1, 128>}, {pipeline_mode = #tpu.pipeline_mode<synchronous>, transform_indices = @transform_7, window_bounds = array<i64: 1, 32>}, {pipeline_mode = #tpu.pipeline_mode<synchronous>, transform_indices = @transform_8, window_bounds = array<i64: 32, 8>}, {pipeline_mode = #tpu.pipeline_mode<synchronous>, transform_indices = @transform_9, window_bounds = array<i64: 1, 8>}, {pipeline_mode = #tpu.pipeline_mode<synchronous>, transform_indices = @transform_10, window_bounds = array<i64: 8, 128>}, {pipeline_mode = #tpu.pipeline_mode<synchronous>, transform_indices = @transform_11, window_bounds = array<i64: 8, 16>}, {pipeline_mode = #tpu.pipeline_mode<synchronous>, transform_indices = @transform_12, window_bounds = array<i64: 16, 32>}, {pipeline_mode = #tpu.pipeline_mode<synchronous>, transform_indices = @transform_13, window_bounds = array<i64: 1, 32>}, {pipeline_mode = #tpu.pipeline_mode<synchronous>, transform_indices = @transform_14, window_bounds = array<i64: 32, 32>}, {pipeline_mode = #tpu.pipeline_mode<synchronous>, transform_indices = @transform_15, window_bounds = array<i64: 1, 32>}, {pipeline_mode = #tpu.pipeline_mode<synchronous>, transform_indices = @transform_16, window_bounds = array<i64: 32, 8>}, {pipeline_mode = #tpu.pipeline_mode<synchronous>, transform_indices = @transform_17, window_bounds = array<i64: 1, 8>}, {pipeline_mode = #tpu.pipeline_mode<synchronous>, transform_indices = @transform_18, window_bounds = array<i64: 16, 32>}, {pipeline_mode = #tpu.pipeline_mode<synchronous>, transform_indices = @transform_19, window_bounds = array<i64: 1, 32>}, {pipeline_mode = #tpu.pipeline_mode<synchronous>, transform_indices = @transform_20, window_bounds = array<i64: 32, 32>}, {pipeline_mode = #tpu.pipeline_mode<synchronous>, transform_indices = @transform_21, window_bounds = array<i64: 1, 32>}, {pipeline_mode = #tpu.pipeline_mode<synchronous>, transform_indices = @transform_22, window_bounds = array<i64: 32, 128>}, {pipeline_mode = #tpu.pipeline_mode<synchronous>, transform_indices = @transform_23, window_bounds = array<i64: 1, 128>}, {pipeline_mode = #tpu.pipeline_mode<synchronous>, transform_indices = @transform_24, window_bounds = array<i64: 8, 128>}]} {
    %c0 = arith.constant 0 : index
    %c0_0 = arith.constant 0 : index
    %0 = vector.load %arg1[%c0, %c0_0] : memref<128x16xbf16, #tpu.memory_space<vmem>>, vector<128x16xbf16>
    %c0_1 = arith.constant 0 : index
    %c0_2 = arith.constant 0 : index
    %1 = vector.load %arg2[%c0_1, %c0_2] : memref<128x128xbf16, #tpu.memory_space<vmem>>, vector<128x128xbf16>
    %c0_3 = arith.constant 0 : index
    %c0_4 = arith.constant 0 : index
    %2 = vector.load %arg3[%c0_3, %c0_4] : memref<16x256xbf16, #tpu.memory_space<vmem>>, vector<16x256xbf16>
    %c0_5 = arith.constant 0 : index
    %c0_6 = arith.constant 0 : index
    %3 = vector.load %arg4[%c0_5, %c0_6] : memref<1x128xf32, #tpu.memory_space<vmem>>, vector<1x128xf32>
    %c0_7 = arith.constant 0 : index
    %c0_8 = arith.constant 0 : index
    %4 = vector.load %arg5[%c0_7, %c0_8] : memref<1x32xf32, #tpu.memory_space<vmem>>, vector<1x32xf32>
    %c0_9 = arith.constant 0 : index
    %c0_10 = arith.constant 0 : index
    %5 = vector.load %arg6[%c0_9, %c0_10] : memref<32x256xbf16, #tpu.memory_space<vmem>>, vector<32x256xbf16>
    %c0_11 = arith.constant 0 : index
    %c0_12 = arith.constant 0 : index
    %6 = vector.load %arg7[%c0_11, %c0_12] : memref<1x128xf32, #tpu.memory_space<vmem>>, vector<1x128xf32>
    %c0_13 = arith.constant 0 : index
    %c0_14 = arith.constant 0 : index
    %7 = vector.load %arg8[%c0_13, %c0_14] : memref<1x32xf32, #tpu.memory_space<vmem>>, vector<1x32xf32>
    %c0_15 = arith.constant 0 : index
    %c0_16 = arith.constant 0 : index
    %8 = vector.load %arg9[%c0_15, %c0_16] : memref<32x8xbf16, #tpu.memory_space<vmem>>, vector<32x8xbf16>
    %c0_17 = arith.constant 0 : index
    %c0_18 = arith.constant 0 : index
    %9 = vector.load %arg10[%c0_17, %c0_18] : memref<1x8xf32, #tpu.memory_space<vmem>>, vector<1x8xf32>
    %c0_19 = arith.constant 0 : index
    %c0_20 = arith.constant 0 : index
    %10 = vector.load %arg11[%c0_19, %c0_20] : memref<8x128xbf16, #tpu.memory_space<vmem>>, vector<8x128xbf16>
    %c0_21 = arith.constant 0 : index
    %c0_22 = arith.constant 0 : index
    %11 = vector.load %arg12[%c0_21, %c0_22] : memref<8x16xbf16, #tpu.memory_space<vmem>>, vector<8x16xbf16>
    %c0_23 = arith.constant 0 : index
    %c0_24 = arith.constant 0 : index
    %12 = vector.load %arg13[%c0_23, %c0_24] : memref<16x32xbf16, #tpu.memory_space<vmem>>, vector<16x32xbf16>
    %c0_25 = arith.constant 0 : index
    %c0_26 = arith.constant 0 : index
    %13 = vector.load %arg14[%c0_25, %c0_26] : memref<1x32xf32, #tpu.memory_space<vmem>>, vector<1x32xf32>
    %c0_27 = arith.constant 0 : index
    %c0_28 = arith.constant 0 : index
    %14 = vector.load %arg15[%c0_27, %c0_28] : memref<32x32xbf16, #tpu.memory_space<vmem>>, vector<32x32xbf16>
    %c0_29 = arith.constant 0 : index
    %c0_30 = arith.constant 0 : index
    %15 = vector.load %arg16[%c0_29, %c0_30] : memref<1x32xf32, #tpu.memory_space<vmem>>, vector<1x32xf32>
    %c0_31 = arith.constant 0 : index
    %c0_32 = arith.constant 0 : index
    %16 = vector.load %arg17[%c0_31, %c0_32] : memref<32x8xbf16, #tpu.memory_space<vmem>>, vector<32x8xbf16>
    %c0_33 = arith.constant 0 : index
    %c0_34 = arith.constant 0 : index
    %17 = vector.load %arg18[%c0_33, %c0_34] : memref<1x8xf32, #tpu.memory_space<vmem>>, vector<1x8xf32>
    %c0_35 = arith.constant 0 : index
    %c0_36 = arith.constant 0 : index
    %18 = vector.load %arg19[%c0_35, %c0_36] : memref<16x32xbf16, #tpu.memory_space<vmem>>, vector<16x32xbf16>
    %c0_37 = arith.constant 0 : index
    %c0_38 = arith.constant 0 : index
    %19 = vector.load %arg20[%c0_37, %c0_38] : memref<1x32xf32, #tpu.memory_space<vmem>>, vector<1x32xf32>
    %c0_39 = arith.constant 0 : index
    %c0_40 = arith.constant 0 : index
    %20 = vector.load %arg21[%c0_39, %c0_40] : memref<32x32xbf16, #tpu.memory_space<vmem>>, vector<32x32xbf16>
    %c0_41 = arith.constant 0 : index
    %c0_42 = arith.constant 0 : index
    %21 = vector.load %arg22[%c0_41, %c0_42] : memref<1x32xf32, #tpu.memory_space<vmem>>, vector<1x32xf32>
    %c0_43 = arith.constant 0 : index
    %c0_44 = arith.constant 0 : index
    %22 = vector.load %arg23[%c0_43, %c0_44] : memref<32x128xbf16, #tpu.memory_space<vmem>>, vector<32x128xbf16>
    %c0_45 = arith.constant 0 : index
    %c0_46 = arith.constant 0 : index
    %23 = vector.load %arg24[%c0_45, %c0_46] : memref<1x128xf32, #tpu.memory_space<vmem>>, vector<1x128xf32>
    %cst = arith.constant dense<0.000000e+00> : vector<128x256xf32>
    %24 = tpu.matmul %0, %2, %cst {dimension_numbers = #tpu.dot_dimension_numbers<[1], [0], [0], [1], [0, 0, 1, 1], [], []>} : vector<128x16xbf16>, vector<16x256xbf16>, vector<128x256xf32> -> vector<128x256xf32>
    %25 = vector.extract_strided_slice %24 {offsets = [0, 0], sizes = [128, 128], strides = [1, 1]} : vector<128x256xf32> to vector<128x128xf32>
    %26 = arith.truncf %25 : vector<128x128xf32> to vector<128x128xbf16>
    %27 = vector.extract_strided_slice %24 {offsets = [0, 128], sizes = [128, 128], strides = [1, 1]} : vector<128x256xf32> to vector<128x128xf32>
    %28 = vector.broadcast %3 : vector<1x128xf32> to vector<128x128xf32>
    %29 = arith.addf %27, %28 : vector<128x128xf32>
    %cst_47 = arith.constant dense<0.000000e+00> : vector<128x128xf32>
    %30 = tpu.matmul %1, %26, %cst_47 {dimension_numbers = #tpu.dot_dimension_numbers<[1], [0], [0], [1], [0, 0, 1, 1], [], []>} : vector<128x128xbf16>, vector<128x128xbf16>, vector<128x128xf32> -> vector<128x128xf32>
    %31 = arith.mulf %30, %29 : vector<128x128xf32>
    %c32_i32 = arith.constant 32 : i32
    %32 = tpu.dynamic_rotate %31 by %c32_i32 dim 1 : vector<128x128xf32>, i32 -> vector<128x128xf32>
    %33 = arith.addf %31, %32 : vector<128x128xf32>
    %c64_i32 = arith.constant 64 : i32
    %34 = tpu.dynamic_rotate %31 by %c64_i32 dim 1 : vector<128x128xf32>, i32 -> vector<128x128xf32>
    %35 = arith.addf %33, %34 : vector<128x128xf32>
    %c96_i32 = arith.constant 96 : i32
    %36 = tpu.dynamic_rotate %31 by %c96_i32 dim 1 : vector<128x128xf32>, i32 -> vector<128x128xf32>
    %37 = arith.addf %35, %36 : vector<128x128xf32>
    %38 = vector.extract_strided_slice %37 {offsets = [0, 0], sizes = [128, 32], strides = [1, 1]} : vector<128x128xf32> to vector<128x32xf32>
    %39 = vector.broadcast %4 : vector<1x32xf32> to vector<128x32xf32>
    %40 = arith.addf %38, %39 : vector<128x32xf32>
    %41 = arith.truncf %40 : vector<128x32xf32> to vector<128x32xbf16>
    %cst_48 = arith.constant dense<0.000000e+00> : vector<128x256xf32>
    %42 = tpu.matmul %41, %5, %cst_48 {dimension_numbers = #tpu.dot_dimension_numbers<[1], [0], [0], [1], [0, 0, 1, 1], [], []>} : vector<128x32xbf16>, vector<32x256xbf16>, vector<128x256xf32> -> vector<128x256xf32>
    %43 = vector.extract_strided_slice %42 {offsets = [0, 0], sizes = [128, 128], strides = [1, 1]} : vector<128x256xf32> to vector<128x128xf32>
    %44 = arith.truncf %43 : vector<128x128xf32> to vector<128x128xbf16>
    %45 = vector.extract_strided_slice %42 {offsets = [0, 128], sizes = [128, 128], strides = [1, 1]} : vector<128x256xf32> to vector<128x128xf32>
    %46 = vector.broadcast %6 : vector<1x128xf32> to vector<128x128xf32>
    %47 = arith.addf %45, %46 : vector<128x128xf32>
    %cst_49 = arith.constant dense<0.000000e+00> : vector<128x128xf32>
    %48 = tpu.matmul %1, %44, %cst_49 {dimension_numbers = #tpu.dot_dimension_numbers<[1], [0], [0], [1], [0, 0, 1, 1], [], []>} : vector<128x128xbf16>, vector<128x128xbf16>, vector<128x128xf32> -> vector<128x128xf32>
    %49 = arith.mulf %48, %47 : vector<128x128xf32>
    %c32_i32_50 = arith.constant 32 : i32
    %50 = tpu.dynamic_rotate %49 by %c32_i32_50 dim 1 : vector<128x128xf32>, i32 -> vector<128x128xf32>
    %51 = arith.addf %49, %50 : vector<128x128xf32>
    %c64_i32_51 = arith.constant 64 : i32
    %52 = tpu.dynamic_rotate %49 by %c64_i32_51 dim 1 : vector<128x128xf32>, i32 -> vector<128x128xf32>
    %53 = arith.addf %51, %52 : vector<128x128xf32>
    %c96_i32_52 = arith.constant 96 : i32
    %54 = tpu.dynamic_rotate %49 by %c96_i32_52 dim 1 : vector<128x128xf32>, i32 -> vector<128x128xf32>
    %55 = arith.addf %53, %54 : vector<128x128xf32>
    %56 = vector.extract_strided_slice %55 {offsets = [0, 0], sizes = [128, 32], strides = [1, 1]} : vector<128x128xf32> to vector<128x32xf32>
    %57 = vector.broadcast %7 : vector<1x32xf32> to vector<128x32xf32>
    %58 = arith.addf %56, %57 : vector<128x32xf32>
    %59 = arith.truncf %58 : vector<128x32xf32> to vector<128x32xbf16>
    %cst_53 = arith.constant dense<0.000000e+00> : vector<128x8xf32>
    %60 = tpu.matmul %59, %8, %cst_53 {dimension_numbers = #tpu.dot_dimension_numbers<[1], [0], [0], [1], [0, 0, 1, 1], [], []>} : vector<128x32xbf16>, vector<32x8xbf16>, vector<128x8xf32> -> vector<128x8xf32>
    %61 = vector.broadcast %9 : vector<1x8xf32> to vector<128x8xf32>
    %62 = arith.addf %60, %61 : vector<128x8xf32>
    %cst_54 = arith.constant 0.000000e+00 : f32
    %63 = vector.broadcast %cst_54 : f32 to vector<128x8xf32>
    %64 = arith.maximumf %62, %63 : vector<128x8xf32>
    %65 = arith.truncf %64 : vector<128x8xf32> to vector<128x8xbf16>
    %cst_55 = arith.constant dense<0.000000e+00> : vector<8x8xf32>
    %66 = tpu.matmul %10, %65, %cst_55 {dimension_numbers = #tpu.dot_dimension_numbers<[1], [0], [0], [1], [0, 0, 1, 1], [], []>} : vector<8x128xbf16>, vector<128x8xbf16>, vector<8x8xf32> -> vector<8x8xf32>
    %cst_56 = arith.constant dense<0.000000e+00> : vector<8x32xf32>
    %67 = tpu.matmul %11, %12, %cst_56 {dimension_numbers = #tpu.dot_dimension_numbers<[1], [0], [0], [1], [0, 0, 1, 1], [], []>} : vector<8x16xbf16>, vector<16x32xbf16>, vector<8x32xf32> -> vector<8x32xf32>
    %68 = vector.broadcast %13 : vector<1x32xf32> to vector<8x32xf32>
    %69 = arith.addf %67, %68 : vector<8x32xf32>
    %cst_57 = arith.constant 0.000000e+00 : f32
    %70 = vector.broadcast %cst_57 : f32 to vector<8x32xf32>
    %71 = arith.maximumf %69, %70 : vector<8x32xf32>
    %72 = arith.truncf %71 : vector<8x32xf32> to vector<8x32xbf16>
    %cst_58 = arith.constant dense<0.000000e+00> : vector<8x32xf32>
    %73 = tpu.matmul %72, %14, %cst_58 {dimension_numbers = #tpu.dot_dimension_numbers<[1], [0], [0], [1], [0, 0, 1, 1], [], []>} : vector<8x32xbf16>, vector<32x32xbf16>, vector<8x32xf32> -> vector<8x32xf32>
    %74 = vector.broadcast %15 : vector<1x32xf32> to vector<8x32xf32>
    %75 = arith.addf %73, %74 : vector<8x32xf32>
    %cst_59 = arith.constant 0.000000e+00 : f32
    %76 = vector.broadcast %cst_59 : f32 to vector<8x32xf32>
    %77 = arith.maximumf %75, %76 : vector<8x32xf32>
    %78 = arith.truncf %77 : vector<8x32xf32> to vector<8x32xbf16>
    %cst_60 = arith.constant dense<0.000000e+00> : vector<8x8xf32>
    %79 = tpu.matmul %78, %16, %cst_60 {dimension_numbers = #tpu.dot_dimension_numbers<[1], [0], [0], [1], [0, 0, 1, 1], [], []>} : vector<8x32xbf16>, vector<32x8xbf16>, vector<8x8xf32> -> vector<8x8xf32>
    %80 = vector.broadcast %17 : vector<1x8xf32> to vector<8x8xf32>
    %81 = arith.addf %79, %80 : vector<8x8xf32>
    %cst_61 = arith.constant 0.000000e+00 : f32
    %82 = vector.broadcast %cst_61 : f32 to vector<8x8xf32>
    %83 = arith.maximumf %81, %82 : vector<8x8xf32>
    %84 = arith.truncf %83 : vector<8x8xf32> to vector<8x8xbf16>
    %85 = arith.truncf %66 : vector<8x8xf32> to vector<8x8xbf16>
    %86 = tpu.concatenate %85, %84 in 1 : vector<8x8xbf16>, vector<8x8xbf16> -> vector<8x16xbf16>
    %cst_62 = arith.constant dense<0.000000e+00> : vector<8x32xf32>
    %87 = tpu.matmul %86, %18, %cst_62 {dimension_numbers = #tpu.dot_dimension_numbers<[1], [0], [0], [1], [0, 0, 1, 1], [], []>} : vector<8x16xbf16>, vector<16x32xbf16>, vector<8x32xf32> -> vector<8x32xf32>
    %88 = vector.broadcast %19 : vector<1x32xf32> to vector<8x32xf32>
    %89 = arith.addf %87, %88 : vector<8x32xf32>
    %cst_63 = arith.constant 0.000000e+00 : f32
    %90 = vector.broadcast %cst_63 : f32 to vector<8x32xf32>
    %91 = arith.maximumf %89, %90 : vector<8x32xf32>
    %92 = arith.truncf %91 : vector<8x32xf32> to vector<8x32xbf16>
    %cst_64 = arith.constant dense<0.000000e+00> : vector<8x32xf32>
    %93 = tpu.matmul %92, %20, %cst_64 {dimension_numbers = #tpu.dot_dimension_numbers<[1], [0], [0], [1], [0, 0, 1, 1], [], []>} : vector<8x32xbf16>, vector<32x32xbf16>, vector<8x32xf32> -> vector<8x32xf32>
    %94 = vector.broadcast %21 : vector<1x32xf32> to vector<8x32xf32>
    %95 = arith.addf %93, %94 : vector<8x32xf32>
    %cst_65 = arith.constant 0.000000e+00 : f32
    %96 = vector.broadcast %cst_65 : f32 to vector<8x32xf32>
    %97 = arith.maximumf %95, %96 : vector<8x32xf32>
    %98 = arith.truncf %97 : vector<8x32xf32> to vector<8x32xbf16>
    %cst_66 = arith.constant dense<0.000000e+00> : vector<8x128xf32>
    %99 = tpu.matmul %98, %22, %cst_66 {dimension_numbers = #tpu.dot_dimension_numbers<[1], [0], [0], [1], [0, 0, 1, 1], [], []>} : vector<8x32xbf16>, vector<32x128xbf16>, vector<8x128xf32> -> vector<8x128xf32>
    %100 = vector.broadcast %23 : vector<1x128xf32> to vector<8x128xf32>
    %101 = arith.addf %99, %100 : vector<8x128xf32>
    %c0_67 = arith.constant 0 : index
    %c0_68 = arith.constant 0 : index
    %102 = vector.load %arg25[%c0_67, %c0_68] : memref<8x128xf32, #tpu.memory_space<vmem>>, vector<8x128xf32>
    tpu.vector_store %arg25[%c0_67, %c0_68], %101 {strides = array<i32>} : memref<8x128xf32, #tpu.memory_space<vmem>>, vector<8x128xf32>,
    return
  }
  func.func @transform_0(%arg0: i32) -> (i32, i32) {
    %c0_i32 = arith.constant 0 : i32
    %c0_i32_0 = arith.constant 0 : i32
    %c0_i32_1 = arith.constant 0 : i32
    return %c0_i32, %c0_i32_0 : i32, i32
  }
  func.func @transform_1(%arg0: i32) -> (i32, i32) {
    %c0_i32 = arith.constant 0 : i32
    %c0_i32_0 = arith.constant 0 : i32
    %c0_i32_1 = arith.constant 0 : i32
    return %c0_i32, %c0_i32_0 : i32, i32
  }
  func.func @transform_2(%arg0: i32) -> (i32, i32) {
    %c0_i32 = arith.constant 0 : i32
    %c0_i32_0 = arith.constant 0 : i32
    %c0_i32_1 = arith.constant 0 : i32
    return %c0_i32, %c0_i32_0 : i32, i32
  }
  func.func @transform_3(%arg0: i32) -> (i32, i32) {
    %c0_i32 = arith.constant 0 : i32
    %c0_i32_0 = arith.constant 0 : i32
    %c0_i32_1 = arith.constant 0 : i32
    return %c0_i32, %c0_i32_0 : i32, i32
  }
  func.func @transform_4(%arg0: i32) -> (i32, i32) {
    %c0_i32 = arith.constant 0 : i32
    %c0_i32_0 = arith.constant 0 : i32
    %c0_i32_1 = arith.constant 0 : i32
    return %c0_i32, %c0_i32_0 : i32, i32
  }
  func.func @transform_5(%arg0: i32) -> (i32, i32) {
    %c0_i32 = arith.constant 0 : i32
    %c0_i32_0 = arith.constant 0 : i32
    %c0_i32_1 = arith.constant 0 : i32
    return %c0_i32, %c0_i32_0 : i32, i32
  }
  func.func @transform_6(%arg0: i32) -> (i32, i32) {
    %c0_i32 = arith.constant 0 : i32
    %c0_i32_0 = arith.constant 0 : i32
    %c0_i32_1 = arith.constant 0 : i32
    return %c0_i32, %c0_i32_0 : i32, i32
  }
  func.func @transform_7(%arg0: i32) -> (i32, i32) {
    %c0_i32 = arith.constant 0 : i32
    %c0_i32_0 = arith.constant 0 : i32
    %c0_i32_1 = arith.constant 0 : i32
    return %c0_i32, %c0_i32_0 : i32, i32
  }
  func.func @transform_8(%arg0: i32) -> (i32, i32) {
    %c0_i32 = arith.constant 0 : i32
    %c0_i32_0 = arith.constant 0 : i32
    %c0_i32_1 = arith.constant 0 : i32
    return %c0_i32, %c0_i32_0 : i32, i32
  }
  func.func @transform_9(%arg0: i32) -> (i32, i32) {
    %c0_i32 = arith.constant 0 : i32
    %c0_i32_0 = arith.constant 0 : i32
    %c0_i32_1 = arith.constant 0 : i32
    return %c0_i32, %c0_i32_0 : i32, i32
  }
  func.func @transform_10(%arg0: i32) -> (i32, i32) {
    %c0_i32 = arith.constant 0 : i32
    %c0_i32_0 = arith.constant 0 : i32
    %c0_i32_1 = arith.constant 0 : i32
    return %c0_i32, %c0_i32_0 : i32, i32
  }
  func.func @transform_11(%arg0: i32) -> (i32, i32) {
    %c0_i32 = arith.constant 0 : i32
    %c0_i32_0 = arith.constant 0 : i32
    %c0_i32_1 = arith.constant 0 : i32
    return %c0_i32, %c0_i32_0 : i32, i32
  }
  func.func @transform_12(%arg0: i32) -> (i32, i32) {
    %c0_i32 = arith.constant 0 : i32
    %c0_i32_0 = arith.constant 0 : i32
    %c0_i32_1 = arith.constant 0 : i32
    return %c0_i32, %c0_i32_0 : i32, i32
  }
  func.func @transform_13(%arg0: i32) -> (i32, i32) {
    %c0_i32 = arith.constant 0 : i32
    %c0_i32_0 = arith.constant 0 : i32
    %c0_i32_1 = arith.constant 0 : i32
    return %c0_i32, %c0_i32_0 : i32, i32
  }
  func.func @transform_14(%arg0: i32) -> (i32, i32) {
    %c0_i32 = arith.constant 0 : i32
    %c0_i32_0 = arith.constant 0 : i32
    %c0_i32_1 = arith.constant 0 : i32
    return %c0_i32, %c0_i32_0 : i32, i32
  }
  func.func @transform_15(%arg0: i32) -> (i32, i32) {
    %c0_i32 = arith.constant 0 : i32
    %c0_i32_0 = arith.constant 0 : i32
    %c0_i32_1 = arith.constant 0 : i32
    return %c0_i32, %c0_i32_0 : i32, i32
  }
  func.func @transform_16(%arg0: i32) -> (i32, i32) {
    %c0_i32 = arith.constant 0 : i32
    %c0_i32_0 = arith.constant 0 : i32
    %c0_i32_1 = arith.constant 0 : i32
    return %c0_i32, %c0_i32_0 : i32, i32
  }
  func.func @transform_17(%arg0: i32) -> (i32, i32) {
    %c0_i32 = arith.constant 0 : i32
    %c0_i32_0 = arith.constant 0 : i32
    %c0_i32_1 = arith.constant 0 : i32
    return %c0_i32, %c0_i32_0 : i32, i32
  }
  func.func @transform_18(%arg0: i32) -> (i32, i32) {
    %c0_i32 = arith.constant 0 : i32
    %c0_i32_0 = arith.constant 0 : i32
    %c0_i32_1 = arith.constant 0 : i32
    return %c0_i32, %c0_i32_0 : i32, i32
  }
  func.func @transform_19(%arg0: i32) -> (i32, i32) {
    %c0_i32 = arith.constant 0 : i32
    %c0_i32_0 = arith.constant 0 : i32
    %c0_i32_1 = arith.constant 0 : i32
    return %c0_i32, %c0_i32_0 : i32, i32
  }
  func.func @transform_20(%arg0: i32) -> (i32, i32) {
    %c0_i32 = arith.constant 0 : i32
    %c0_i32_0 = arith.constant 0 : i32
    %c0_i32_1 = arith.constant 0 : i32
    return %c0_i32, %c0_i32_0 : i32, i32
  }
  func.func @transform_21(%arg0: i32) -> (i32, i32) {
    %c0_i32 = arith.constant 0 : i32
    %c0_i32_0 = arith.constant 0 : i32
    %c0_i32_1 = arith.constant 0 : i32
    return %c0_i32, %c0_i32_0 : i32, i32
  }
  func.func @transform_22(%arg0: i32) -> (i32, i32) {
    %c0_i32 = arith.constant 0 : i32
    %c0_i32_0 = arith.constant 0 : i32
    %c0_i32_1 = arith.constant 0 : i32
    return %c0_i32, %c0_i32_0 : i32, i32
  }
  func.func @transform_23(%arg0: i32) -> (i32, i32) {
    %c0_i32 = arith.constant 0 : i32
    %c0_i32_0 = arith.constant 0 : i32
    %c0_i32_1 = arith.constant 0 : i32
    return %c0_i32, %c0_i32_0 : i32, i32
  }
  func.func @transform_24(%arg0: i32) -> (i32, i32) {
    %c0_i32 = arith.constant 0 : i32
    %c0_i32_0 = arith.constant 0 : i32
    %c0_i32_1 = arith.constant 0 : i32
    return %c0_i32, %c0_i32_0 : i32, i32
  }
}

</mosaic_0001>

<bundles_post_ra>
// kernel: egconv_model_forward.1
= control target key start
LH: loop header
LB: loop body
LE: loop exit
PB: predicated region body
PF: predicated region fallthrough
CT: control target
= control target key end

     0   :  { %s3466_s0 = inlined_call_operand.vmem [shape: bf16[128,16], index: 0, kind: input, shape index: {}]   ;;  %s3467_s1 = inlined_call_operand.vmem [shape: bf16[128,128], index: 1, kind: input, shape index: {}]   ;;  %s3468_s2 = inlined_call_operand.vmem [shape: bf16[16,256], index: 2, kind: input, shape index: {}]   ;;  %s3469_s3 = inlined_call_operand.hbm [shape: f32[1,128], index: 3, kind: input, shape index: {}]   ;;  %s3470_s4 = inlined_call_operand.hbm [shape: f32[1,32], index: 4, kind: input, shape index: {}]   ;;  %s3471_s5 = inlined_call_operand.vmem [shape: bf16[32,256], index: 5, kind: input, shape index: {}]   ;;  %s3472_s6 = inlined_call_operand.hbm [shape: f32[1,128], index: 6, kind: input, shape index: {}]   ;;  %s3473_s7 = inlined_call_operand.hbm [shape: f32[1,32], index: 7, kind: input, shape index: {}]   ;;  %s3474_s8 = inlined_call_operand.vmem [shape: bf16[32,8], index: 8, kind: input, shape index: {}]   ;;  %s3475_s9 = inlined_call_operand.hbm [shape: f32[1,8], index: 9, kind: input, shape index: {}]   ;;  %s3476_s10 = inlined_call_operand.vmem [shape: bf16[8,128], index: 10, kind: input, shape index: {}]   ;;  %s3477_s11 = inlined_call_operand.vmem [shape: bf16[8,16], index: 11, kind: input, shape index: {}]   ;;  %s3478_s12 = inlined_call_operand.hbm [shape: bf16[16,32], index: 12, kind: input, shape index: {}]   ;;  %s3479_s13 = inlined_call_operand.hbm [shape: f32[1,32], index: 13, kind: input, shape index: {}]   ;;  %s3480_s14 = inlined_call_operand.vmem [shape: bf16[32,32], index: 14, kind: input, shape index: {}]   ;;  %s3481_s15 = inlined_call_operand.hbm [shape: f32[1,32], index: 15, kind: input, shape index: {}]   ;;  %s3482_s16 = inlined_call_operand.vmem [shape: bf16[32,8], index: 16, kind: input, shape index: {}]   ;;  %s3483_s17 = inlined_call_operand.hbm [shape: f32[1,8], index: 17, kind: input, shape index: {}]   ;;  %s3484_s18 = inlined_call_operand.hbm [shape: bf16[16,32], index: 18, kind: input, shape index: {}]   ;;  %s3485_s19 = inlined_call_operand.hbm [shape: f32[1,32], index: 19, kind: input, shape index: {}]   ;;  %s3486_s20 = inlined_call_operand.vmem [shape: bf16[32,32], index: 20, kind: input, shape index: {}]   ;;  %s3487_s21 = inlined_call_operand.hbm [shape: f32[1,32], index: 21, kind: input, shape index: {}]   ;;  %s3488_s22 = inlined_call_operand.hbm [shape: bf16[32,128], index: 22, kind: input, shape index: {}]   ;;  %s3489_s23 = inlined_call_operand.hbm [shape: f32[1,128], index: 23, kind: input, shape index: {}]   ;;  %s3490_s24 = inlined_call_operand.hbm [shape: f32[8,128], index: 24, kind: output, shape index: {}]  }
   0x1   :  { %3496 = sst [smem:[#allocation35_spill]] %s3466_s0 }
   0x2   :  { %3497 = sst [smem:[#allocation36_spill]] %s3467_s1 }
   0x3   :  { %3498 = sst [smem:[#allocation37_spill]] %s3468_s2 }
   0x4   :  { %3499 = sst [smem:[#allocation38_spill]] %s3469_s3 }
   0x5   :  { %3500 = sst [smem:[#allocation39_spill]] %s3470_s4 }
   0x6   :  { %3501 = sst [smem:[#allocation40_spill]] %s3471_s5 }
   0x7   :  { %3502 = sst [smem:[#allocation41_spill]] %s3472_s6 }
   0x8   :  { %3503 = sst [smem:[#allocation42_spill]] %s3473_s7 }
   0x9   :  { %3504 = sst [smem:[#allocation43_spill]] %s3474_s8 }
   0xa   :  { %29 = vsyncpa [#allocation3], 0 }
   0xb   :  { %30 = vsyncpa [#allocation6], 0 }
   0xc   :  { %31 = vsyncpa [#allocation9], 0 }
   0xd   :  { %32 = vsyncpa [#allocation12], 0 }
   0xe   :  { %33 = vsyncpa [#allocation15], 0 }
   0xf   :  { %34 = vsyncpa [#allocation18], 0 }
  0x10   :  { %35 = vsyncpa [#allocation21], 0 }
  0x11   :  { %36 = vsyncpa [#allocation24], 0 }
  0x12   :  { %37 = vsyncpa [#allocation4], 0  ;;  %s2615_s5 = smov [#allocation5]   ;;  %s2616_s27 = smov [#allocation8]  }
  0x13   :  { %s60_s26 = sshll.u32 %s2615_s5, 4  ;;  %s82_s28 = sshll.u32 %s2616_s27, 4  ;;  %s61_s26 = int_to_ptr.vmem [resolvable:$true] %s60_s26  ;;  %s83_s28 = int_to_ptr.vmem [resolvable:$true] %s82_s28 }
  0x14   :  { %s2305_s6 = scalar_lea.vmem %s61_s26, 16  ;;  %s2309_s2 = scalar_lea.vmem %s61_s26, 32 }
  0x15   :  { %p2306_p0 = scmp.ne.s32.totalorder %s61_s26, %s2305_s6  ;;  %p2310_p1 = scmp.lt.s32.totalorder %s61_s26, %s61_s26 }
  0x16   :  { %p2311_p2 = scmp.lt.s32.totalorder %s2309_s2, %s2305_s6 }
  0x18   :  { %p2312_p3 = por %p2311_p2, %p2310_p1 }
  0x1a   :  { %p2313_p4 = pnand %p2312_p3, %p2306_p0 }
  0x1c   :  { %2316 = shalt.err (!%p2313_p4)
}
  0x1d   :  { %s3505_s7 = sld [smem:[#allocation39_spill]]  ;;  %s2325_s30 = scalar_lea.vmem %s83_s28, 16 }
  0x1e   :  { %p2326_p5 = scmp.ne.s32.totalorder %s83_s28, %s2325_s30  ;;  %s2329_s3 = scalar_lea.vmem %s83_s28, 32 }
  0x1f   :  { %p2330_p6 = scmp.lt.s32.totalorder %s83_s28, %s83_s28  ;;  %p2331_p7 = scmp.lt.s32.totalorder %s2329_s3, %s2325_s30 }
  0x21   :  { %p2332_p8 = por %p2331_p7, %p2330_p6 }
  0x23   :  { %63 = dma.hbm_to_vmem [thread:$0]  %s3505_s7, 16, %s61_s26, [#allocation6]  }
  0x24   :  { %p2333_p9 = pnand %p2332_p8, %p2326_p5 }
  0x26   :  { %2336 = shalt.err (!%p2333_p9)
}
  0x27   :  { %s3506_s4 = sld [smem:[#allocation42_spill]]  ;;  %s2617_s1 = smov [#allocation11]  }
  0x28   :  { %s107_s5 = sshll.u32 %s2617_s1, 4  ;;  %s108_s5 = int_to_ptr.vmem [resolvable:$true] %s107_s5 }
  0x29   :  { %s2345_s27 = scalar_lea.vmem %s108_s5, 128  ;;  %p2350_p11 = scmp.lt.s32.totalorder %s108_s5, %s108_s5 }
  0x2a   :  { %p2346_p10 = scmp.ne.s32.totalorder %s108_s5, %s2345_s27  ;;  %p2351_p12 = scmp.lt.s32.totalorder %s2345_s27, %s2345_s27 }
  0x2c   :  { %p2352_p13 = por %p2351_p12, %p2350_p11 }
  0x2d   :  { %85 = dma.hbm_to_vmem [thread:$0]  %s3506_s4, 16, %s83_s28, [#allocation9]  }
  0x2e   :  { %p2353_p0 = pnand %p2352_p13, %p2346_p10 }
  0x30   :  { %2356 = shalt.err (!%p2353_p0)
}
  0x31   :  { %s2618_s26 = smov 64   ;;  %s2619_s6 = smov 4  }
  0x32   :  { %113 = dma.hbm_to_vmem [thread:$0]  %s3478_s12, 128, %s108_s5, [#allocation12], %s2618_s26, %s2618_s26, %s2619_s6  }
  0x33   :  { %s2620_s28 = smov [#allocation14]   ;;  %s2621_s7 = smov [#allocation17]  }
  0x34   :  { %s132_s0 = sshll.u32 %s2620_s28, 4  ;;  %s153_s30 = sshll.u32 %s2621_s7, 4  ;;  %s133_s0 = int_to_ptr.vmem [resolvable:$true] %s132_s0  ;;  %s154_s30 = int_to_ptr.vmem [resolvable:$true] %s153_s30 }
  0x35   :  { %s2365_s3 = scalar_lea.vmem %s133_s0, 16  ;;  %s2369_s25 = scalar_lea.vmem %s133_s0, 32 }
  0x36   :  { %p2366_p1 = scmp.ne.s32.totalorder %s133_s0, %s2365_s3  ;;  %p2370_p2 = scmp.lt.s32.totalorder %s133_s0, %s133_s0 }
  0x37   :  { %p2371_p3 = scmp.lt.s32.totalorder %s2369_s25, %s2365_s3 }
  0x39   :  { %p2372_p4 = por %p2371_p3, %p2370_p2 }
  0x3b   :  { %p2373_p5 = pnand %p2372_p4, %p2366_p1 }
  0x3d   :  { %2376 = shalt.err (!%p2373_p5)
}
  0x3e   :  { %135 = dma.hbm_to_vmem [thread:$0]  %s3481_s15, 16, %s133_s0, [#allocation15]  }
  0x3f   :  { %s2385_s1 = scalar_lea.vmem %s154_s30, 128  ;;  %p2390_p7 = scmp.lt.s32.totalorder %s154_s30, %s154_s30 }
  0x40   :  { %p2386_p6 = scmp.ne.s32.totalorder %s154_s30, %s2385_s1  ;;  %p2391_p8 = scmp.lt.s32.totalorder %s2385_s1, %s2385_s1 }
  0x42   :  { %p2392_p9 = por %p2391_p8, %p2390_p7 }
  0x44   :  { %p2393_p10 = pnand %p2392_p9, %p2386_p6 }
  0x46   :  { %2396 = shalt.err (!%p2393_p10)
}
  0x47   :  { %159 = dma.hbm_to_vmem [thread:$0]  %s3484_s18, 128, %s154_s30, [#allocation18], %s2618_s26, %s2618_s26, %s2619_s6  }
  0x48   :  { %s2622_s27 = smov [#allocation20]   ;;  %s2623_s29 = smov [#allocation2]  }
  0x49   :  { %s178_s2 = sshll.u32 %s2622_s27, 4  ;;  %s50_s15 = sshll.u32 %s2623_s29, 4  ;;  %s179_s2 = int_to_ptr.vmem [resolvable:$true] %s178_s2  ;;  %s51_s15 = int_to_ptr.vmem [resolvable:$true] %s50_s15 }
  0x4a   :  { %s2405_s28 = scalar_lea.vmem %s179_s2, 16  ;;  %s2409_s0 = scalar_lea.vmem %s179_s2, 32 }
  0x4b   :  { %p2406_p11 = scmp.ne.s32.totalorder %s179_s2, %s2405_s28  ;;  %p2410_p12 = scmp.lt.s32.totalorder %s179_s2, %s179_s2 }
  0x4c   :  { %p2411_p13 = scmp.lt.s32.totalorder %s2409_s0, %s2405_s28 }
  0x4e   :  { %p2412_p0 = por %p2411_p13, %p2410_p12 }
  0x50   :  { %p2413_p1 = pnand %p2412_p0, %p2406_p11 }
  0x52   :  { %2416 = shalt.err (!%p2413_p1)
}
  0x53   :  { %181 = dma.hbm_to_vmem [thread:$0]  %s3487_s21, 16, %s179_s2, [#allocation21]  }
  0x54   :  { %s2425_s25 = scalar_lea.vmem %s51_s15, 16  ;;  %s2429_s18 = scalar_lea.vmem %s51_s15, 32 }
  0x55   :  { %p2426_p2 = scmp.ne.s32.totalorder %s51_s15, %s2425_s25  ;;  %p2430_p3 = scmp.lt.s32.totalorder %s51_s15, %s51_s15 }
  0x56   :  { %p2431_p4 = scmp.lt.s32.totalorder %s2429_s18, %s2425_s25 }
  0x58   :  { %p2432_p5 = por %p2431_p4, %p2430_p3 }
  0x5a   :  { %p2433_p6 = pnand %p2432_p5, %p2426_p2 }
  0x5c   :  { %2436 = shalt.err (!%p2433_p6)
}
  0x5d   :  { %s3507_s4 = sld [smem:[#allocation38_spill]]  ;;  %s2624_s1 = smov [#allocation7]  }
  0x5e   :  { %s72_s12 = sshll.u32 %s2624_s1, 4  ;;  %s2625_s5 = smov [#allocation10]   ;;  %s73_s12 = int_to_ptr.vmem [resolvable:$true] %s72_s12 }
  0x5f   :  { %s94_s27 = sshll.u32 %s2625_s5, 4  ;;  %s2445_s29 = scalar_lea.vmem %s73_s12, 16  ;;  %s95_s27 = int_to_ptr.vmem [resolvable:$true] %s94_s27 }
  0x60   :  { %p2446_p7 = scmp.ne.s32.totalorder %s73_s12, %s2445_s29  ;;  %s2449_s21 = scalar_lea.vmem %s73_s12, 32 }
  0x61   :  { %p2450_p8 = scmp.lt.s32.totalorder %s73_s12, %s73_s12  ;;  %p2451_p9 = scmp.lt.s32.totalorder %s2449_s21, %s2445_s29 }
  0x63   :  { %53 = dma.hbm_to_vmem [thread:$0]  %s3507_s4, 16, %s51_s15, [#allocation3]  }
  0x64   :  { %p2452_p10 = por %p2451_p9, %p2450_p8 }
  0x66   :  { %p2453_p11 = pnand %p2452_p10, %p2446_p7 }
  0x68   :  { %2456 = shalt.err (!%p2453_p11)
}
  0x69   :  { %s3508_s0 = sld [smem:[#allocation41_spill]]  ;;  %s2465_s7 = scalar_lea.vmem %s95_s27, 16 }
  0x6a   :  { %p2466_p12 = scmp.ne.s32.totalorder %s95_s27, %s2465_s7  ;;  %s2469_s15 = scalar_lea.vmem %s95_s27, 32 }
  0x6b   :  { %p2470_p13 = scmp.lt.s32.totalorder %s95_s27, %s95_s27  ;;  %p2471_p0 = scmp.lt.s32.totalorder %s2469_s15, %s2465_s7 }
  0x6d   :  { %p2472_p1 = por %p2471_p0, %p2470_p13 }
  0x6f   :  { %75 = dma.hbm_to_vmem [thread:$0]  %s3508_s0, 16, %s73_s12, [#allocation6]  }
  0x70   :  { %p2473_p2 = pnand %p2472_p1, %p2466_p12 }
  0x72   :  { %2476 = shalt.err (!%p2473_p2)
}
  0x73   :  { %97 = dma.hbm_to_vmem [thread:$0]  %s3475_s9, 16, %s95_s27, [#allocation9]  }
  0x74   :  { %s2626_s18 = smov [#allocation13]   ;;  %s2627_s8 = smov [#allocation16]  }
  0x75   :  { %s120_s30 = sshll.u32 %s2626_s18, 4  ;;  %s144_s4 = sshll.u32 %s2627_s8, 4  ;;  %s121_s30 = int_to_ptr.vmem [resolvable:$true] %s120_s30  ;;  %s145_s4 = int_to_ptr.vmem [resolvable:$true] %s144_s4 }
  0x76   :  { %s2485_s1 = scalar_lea.vmem %s121_s30, 16  ;;  %s2489_s12 = scalar_lea.vmem %s121_s30, 32 }
  0x77   :  { %p2486_p3 = scmp.ne.s32.totalorder %s121_s30, %s2485_s1  ;;  %p2490_p4 = scmp.lt.s32.totalorder %s121_s30, %s121_s30 }
  0x78   :  { %p2491_p5 = scmp.lt.s32.totalorder %s2489_s12, %s2485_s1 }
  0x7a   :  { %p2492_p6 = por %p2491_p5, %p2490_p4 }
  0x7c   :  { %p2493_p7 = pnand %p2492_p6, %p2486_p3 }
  0x7e   :  { %2496 = shalt.err (!%p2493_p7)
}
  0x7f   :  { %123 = dma.hbm_to_vmem [thread:$0]  %s3479_s13, 16, %s121_s30, [#allocation12]  }
  0x80   :  { %s2505_s21 = scalar_lea.vmem %s145_s4, 16  ;;  %s2509_s9 = scalar_lea.vmem %s145_s4, 32 }
  0x81   :  { %p2506_p8 = scmp.ne.s32.totalorder %s145_s4, %s2505_s21  ;;  %p2510_p9 = scmp.lt.s32.totalorder %s145_s4, %s145_s4 }
  0x82   :  { %p2511_p10 = scmp.lt.s32.totalorder %s2509_s9, %s2505_s21 }
  0x84   :  { %p2512_p11 = por %p2511_p10, %p2510_p9 }
  0x86   :  { %p2513_p12 = pnand %p2512_p11, %p2506_p8 }
  0x88   :  { %2516 = shalt.err (!%p2513_p12)
}
  0x89   :  { %147 = dma.hbm_to_vmem [thread:$0]  %s3483_s17, 16, %s145_s4, [#allocation15]  }
  0x8a   :  { %s2628_s28 = smov [#allocation19]   ;;  %s2629_s7 = smov [#allocation22]  }
  0x8b   :  { %s166_s0 = sshll.u32 %s2628_s28, 4  ;;  %s187_s15 = sshll.u32 %s2629_s7, 4  ;;  %s167_s0 = int_to_ptr.vmem [resolvable:$true] %s166_s0  ;;  %s188_s15 = int_to_ptr.vmem [resolvable:$true] %s187_s15 }
  0x8c   :  { %s2525_s3 = scalar_lea.vmem %s167_s0, 16  ;;  %s2529_s13 = scalar_lea.vmem %s167_s0, 32 }
  0x8d   :  { %p2526_p13 = scmp.ne.s32.totalorder %s167_s0, %s2525_s3  ;;  %p2530_p0 = scmp.lt.s32.totalorder %s167_s0, %s167_s0 }
  0x8e   :  { %p2531_p1 = scmp.lt.s32.totalorder %s2529_s13, %s2525_s3 }
  0x90   :  { %p2532_p2 = por %p2531_p1, %p2530_p0 }
  0x92   :  { %p2533_p3 = pnand %p2532_p2, %p2526_p13 }
  0x94   :  { %2536 = shalt.err (!%p2533_p3)
}
  0x95   :  { %169 = dma.hbm_to_vmem [thread:$0]  %s3485_s19, 16, %s167_s0, [#allocation18]  }
  0x96   :  { %s2545_s30 = scalar_lea.vmem %s188_s15, 256  ;;  %p2550_p5 = scmp.lt.s32.totalorder %s188_s15, %s188_s15 }
  0x97   :  { %p2546_p4 = scmp.ne.s32.totalorder %s188_s15, %s2545_s30  ;;  %p2551_p6 = scmp.lt.s32.totalorder %s2545_s30, %s2545_s30 }
  0x99   :  { %p2552_p7 = por %p2551_p6, %p2550_p5 }
  0x9b   :  { %p2553_p8 = pnand %p2552_p7, %p2546_p4 }
  0x9d   :  { %2556 = shalt.err (!%p2553_p8)
}
  0x9e   :  { %193 = dma.hbm_to_vmem [thread:$0]  %s3488_s22, 256, %s188_s15, [#allocation21], %s2618_s26, %s2618_s26, %s2619_s6  }
  0x9f   :  { %s2630_s4 = smov [#allocation23]  }
  0xa0   :  { %s200_s1 = sshll.u32 %s2630_s4, 4  ;;  %s201_s1 = int_to_ptr.vmem [resolvable:$true] %s200_s1 }
  0xa1   :  { %s2565_s12 = scalar_lea.vmem %s201_s1, 16  ;;  %s2569_s19 = scalar_lea.vmem %s201_s1, 32 }
  0xa2   :  { %p2566_p9 = scmp.ne.s32.totalorder %s201_s1, %s2565_s12  ;;  %p2570_p10 = scmp.lt.s32.totalorder %s201_s1, %s201_s1 }
  0xa3   :  { %p2571_p11 = scmp.lt.s32.totalorder %s2569_s19, %s2565_s12 }
  0xa5   :  { %p2572_p12 = por %p2571_p11, %p2570_p10 }
  0xa7   :  { %p2573_p13 = pnand %p2572_p12, %p2566_p9 }
  0xa9   :  { %2576 = shalt.err (!%p2573_p13)
}
  0xaa   :  { %203 = dma.hbm_to_vmem [thread:$0]  %s3489_s23, 16, %s201_s1, [#allocation24]  }
  0xab   :  { %2597 = dma.done.wait [#allocation3], 16  }
  0xac   :  { %2598 = vsyncadd [#allocation3], 4294967280 }
  0xad   :  { %2599 = dma.done.wait [#allocation6], 32  }
  0xae   :  { %2600 = vsyncadd [#allocation6], 4294967264 }
  0xaf   :  { %2601 = dma.done.wait [#allocation9], 32  }
  0xb0   :  { %2602 = vsyncadd [#allocation9], 4294967264 }
  0xb1   :  { %2603 = dma.done.wait [#allocation12], 144  }
  0xb2   :  { %2604 = vsyncadd [#allocation12], 4294967152 }
  0xb3   :  { %2605 = dma.done.wait [#allocation15], 32  }
  0xb4   :  { %2606 = vsyncadd [#allocation15], 4294967264 }
  0xb5   :  { %2607 = dma.done.wait [#allocation18], 144  }
  0xb6   :  { %2608 = vsyncadd [#allocation18], 4294967152 }
  0xb7   :  { %2609 = dma.done.wait [#allocation21], 272  }
  0xb8   :  { %2610 = vsyncadd [#allocation21], 4294967024 }
  0xb9   :  { %2611 = dma.done.wait [#allocation24], 16  }
  0xba   :  { %2612 = vsyncadd [#allocation24], 4294967280  ;;  %v2631_v0 = vmov 0   ;;  %s3509_s6 = sld [smem:[#allocation37_spill]]  ;;  %vm372_vm0 = vcmask 130048   ;;  %s2632_s30 = smov 32  }
  0xbb   :  { %429 = vmatprep.mubr.bf16.mxu0 %v2631_v0  ;;  %s3510_s28 = sld [smem:[#allocation35_spill]]  ;;  %v2887_v39 = vld [vmem:[#allocation2] ss:$0 sm:$0xff]  ;;  %s2633_s1 = smov 96   ;;  %vm895_vm1 = vcmask 261120   ;;  %vm2635_vm2 = vmmov 0  }
  0xbc   :  { %s3511_s22 = sld [smem:[#allocation36_spill]]  ;;  %vm1740_vm3 = vcmask 64512  }
  0xbd   :  { %s3512_s4 = sld [smem:[#allocation40_spill]] }
  0xbe   :  { %s3513_s9 = sld [smem:[#allocation43_spill]] }
  0xc0   :  { %v2260_v1 = vld [vmem:[%s3509_s6 + $0x4] ss:$8 sps:$4 sm:$0xff]   ;;  %v2262_v2 = vld [vmem:[%s3509_s6] ss:$8 sps:$4 sm:$0xff]  }
  0xc1   :  { %411 = vmatprep.subr.bf16.mxu0 %v2260_v1  ;;  %v2263_v3 = vld [vmem:[%s3510_s28] sm:$0xff]   ;;  %v2264_v4 = vld [vmem:[%s3510_s28 + $0x8] sm:$0xff]   ;;  %v2265_v5 = vld [vmem:[%s3510_s28 + $0x10] sm:$0xff]  }
  0xc2   :  { %412 = vmatpush1.bf16.msra.mxu0 %v2262_v2  ;;  %v2266_v6 = vld [vmem:[%s3510_s28 + $0x18] sm:$0xff]   ;;  %v2267_v7 = vld [vmem:[%s3510_s28 + $0x20] sm:$0xff]   ;;  %v2268_v8 = vld [vmem:[%s3510_s28 + $0x28] sm:$0xff]  }
  0xc3   :  { %v2269_v9 = vld [vmem:[%s3510_s28 + $0x30] sm:$0xff]   ;;  %v2270_v10 = vld [vmem:[%s3510_s28 + $0x38] sm:$0xff]   ;;  %v2271_v11 = vld [vmem:[%s3511_s22] sm:$0xff]  }
  0xc4   :  { %2105 = vmatprep.mubr.bf16.mxu1 %v2271_v11  ;;  %v2901_v55 = vld [vmem:[%s3511_s22 + $0x8] sm:$0xff]   ;;  %v2906_v56 = vld [vmem:[%s3511_s22 + $0x10] sm:$0xff]   ;;  %v2913_v57 = vld [vmem:[%s3511_s22 + $0x18] sm:$0xff]  }
  0xc5   :  { %1957 = vmatmul.mubr.msk.bf16.vlgmr.msra.gmra.mxu0 %vm372_vm0, %v2263_v3  ;;  %v2918_v58 = vld [vmem:[%s3511_s22 + $0x20] sm:$0xff]   ;;  %v2925_v59 = vld [vmem:[%s3511_s22 + $0x28] sm:$0xff]   ;;  %v2930_v60 = vld [vmem:[%s3511_s22 + $0x30] sm:$0xff]  }
  0xc6   :  { %439 = vmatprep.mubr.bf16.mxu0 %v2631_v0  ;;  %v2937_v61 = vld [vmem:[%s3511_s22 + $0x38] sm:$0xff]  }
  0xcd   :  { %1958 = vmatmul.mubr.msk.bf16.gmra.mxu0 %vm372_vm0, %v2264_v4 }
  0xce   :  { %449 = vmatprep.mubr.bf16.mxu0 %v2631_v0 }
  0xd5   :  { %1959 = vmatmul.mubr.msk.bf16.gmra.mxu0 %vm372_vm0, %v2265_v5 }
  0xd6   :  { %459 = vmatprep.mubr.bf16.mxu0 %v2631_v0 }
  0xdd   :  { %1960 = vmatmul.mubr.msk.bf16.gmra.mxu0 %vm372_vm0, %v2266_v6 }
  0xde   :  { %469 = vmatprep.mubr.bf16.mxu0 %v2631_v0 }
  0xe5   :  { %1961 = vmatmul.mubr.msk.bf16.gmra.mxu0 %vm372_vm0, %v2267_v7 }
  0xe6   :  { %479 = vmatprep.mubr.bf16.mxu0 %v2631_v0 }
  0xed   :  { %1962 = vmatmul.mubr.msk.bf16.gmra.mxu0 %vm372_vm0, %v2268_v8  ;;  %v2281_v8 = vld [vmem:[%s3512_s4 + $0x14] ss:$8 sps:$4 sm:$0xff]  }
  0xee   :  { %489 = vmatprep.mubr.bf16.mxu0 %v2631_v0 }
  0xf5   :  { %1963 = vmatmul.mubr.msk.bf16.gmra.mxu0 %vm372_vm0, %v2269_v9  ;;  %v2279_v9 = vld [vmem:[%s3512_s4 + $0x10] ss:$8 sps:$4 sm:$0xff]  }
  0xf6   :  { %499 = vmatprep.mubr.bf16.mxu0 %v2631_v0 }
  0xfd   :  { %1964 = vmatmul.mubr.msk.bf16.gmra.mxu0 %vm372_vm0, %v2270_v10 }
  0xfe   :  { %2137 = vmatprep.mubr.bf16.mxu0 %v2271_v11  ;;  %v2284_v11 = vld [vmem:[%s3512_s4 + $0x4] ss:$8 sps:$4 sm:$0xff]  }
 0x185   :  { %v431_v12 = vpop.f32.mrf.mxu0 }
 0x187   :  { %v2863_v13 = vpop.f32.mrf.mxu0 }
 0x188   :  { %v524_v1 = vadd.f32 %v2887_v39, %v2863_v13 }
 0x189   :  { %v435_v14 = vpop.f32.mrf.mxu0 }
 0x18a   :  { %v510_v15 = vpack.c.bf16 %v435_v14, %v431_v12  ;;  %v2282_v12 = vld [vmem:[%s3512_s4] ss:$8 sps:$4 sm:$0xff]  }
 0x18b   :  { %v2865_v16 = vpop.f32.mrf.mxu0 }
 0x18c   :  { %v525_v14 = vadd.f32 %v2887_v39, %v2865_v16 }
 0x18d   :  { %v441_v17 = vpop.f32.mrf.mxu0 }
 0x18f   :  { %v2867_v18 = vpop.f32.mrf.mxu0 }
 0x190   :  { %v526_v62 = vadd.f32 %v2887_v39, %v2867_v18 }
 0x191   :  { %v445_v19 = vpop.f32.mrf.mxu0 }
 0x192   :  { %v511_v20 = vpack.c.bf16 %v445_v19, %v441_v17 }
 0x193   :  { %v2869_v21 = vpop.f32.mrf.mxu0 }
 0x194   :  { %v527_v6 = vadd.f32 %v2887_v39, %v2869_v21 }
 0x195   :  { %v451_v22 = vpop.f32.mrf.mxu0 }
 0x197   :  { %v2871_v23 = vpop.f32.mrf.mxu0 }
 0x199   :  { %v455_v24 = vpop.f32.mrf.mxu0 }
 0x19a   :  { %v512_v54 = vpack.c.bf16 %v455_v24, %v451_v22  ;;  %v528_v22 = vadd.f32 %v2887_v39, %v2871_v23 }
 0x19b   :  { %v2873_v25 = vpop.f32.mrf.mxu0 }
 0x19d   :  { %v461_v26 = vpop.f32.mrf.mxu0 }
 0x19f   :  { %v2875_v27 = vpop.f32.mrf.mxu0 }
 0x1a0   :  { %v530_v18 = vadd.f32 %v2887_v39, %v2875_v27 }
 0x1a1   :  { %v465_v28 = vpop.f32.mrf.mxu0 }
 0x1a2   :  { %v513_v53 = vpack.c.bf16 %v465_v28, %v461_v26  ;;  %v529_v26 = vadd.f32 %v2887_v39, %v2873_v25 }
 0x1a3   :  { %v2877_v29 = vpop.f32.mrf.mxu0 }
 0x1a4   :  { %v531_v19 = vadd.f32 %v2887_v39, %v2877_v29 }
 0x1a5   :  { %v471_v30 = vpop.f32.mrf.mxu0 }
 0x1a7   :  { %v2879_v31 = vpop.f32.mrf.mxu0 }
 0x1a9   :  { %v475_v32 = vpop.f32.mrf.mxu0 }
 0x1aa   :  { %v514_v52 = vpack.c.bf16 %v475_v32, %v471_v30 }
 0x1ab   :  { %v2881_v33 = vpop.f32.mrf.mxu0 }
 0x1ad   :  { %v481_v34 = vpop.f32.mrf.mxu0 }
 0x1af   :  { %v2883_v35 = vpop.f32.mrf.mxu0 }
 0x1b0   :  { %v534_v25 = vadd.f32 %v2887_v39, %v2883_v35  ;;  %v532_v35 = vadd.f32 %v2887_v39, %v2879_v31 }
 0x1b1   :  { %v485_v36 = vpop.f32.mrf.mxu0 }
 0x1b2   :  { %v515_v51 = vpack.c.bf16 %v485_v36, %v481_v34 }
 0x1b3   :  { %v2885_v37 = vpop.f32.mrf.mxu0 }
 0x1b4   :  { %v535_v32 = vadd.f32 %v2887_v39, %v2885_v37 }
 0x1b5   :  { %v491_v38 = vpop.f32.mrf.mxu0 }
 0x1b7   :  { %v493_v40 = vpop.f32.mrf.mxu0 }
 0x1b8   :  { %v2890_v41 = vadd.f32 %v2887_v39, %v493_v40 }
 0x1b9   :  { %v495_v42 = vpop.f32.mrf.mxu0 }
 0x1ba   :  { %v516_v50 = vpack.c.bf16 %v495_v42, %v491_v38  ;;  %v533_v38 = vadd.f32 %v2887_v39, %v2881_v33 }
 0x1bb   :  { %v497_v43 = vpop.f32.mrf.mxu0 }
 0x1bc   :  { %v2893_v44 = vadd.f32 %v2887_v39, %v497_v43 }
 0x1bd   :  { %v501_v45 = vpop.f32.mrf.mxu0 }
 0x1bf   :  { %v503_v46 = vpop.f32.mrf.mxu0 }
 0x1c0   :  { %v2896_v47 = vadd.f32 %v2887_v39, %v503_v46 }
 0x1c1   :  { %v505_v48 = vpop.f32.mrf.mxu0 }
 0x1c2   :  { %v517_v49 = vpack.c.bf16 %v505_v48, %v501_v45 }
 0x1c3   :  { %v507_v33 = vpop.f32.mrf.mxu0 }
 0x1c4   :  { %2089 = vmatprep.subr.bf16.mxu1 %v517_v49  ;;  %v539_v46 = vadd.f32 %v2887_v39, %v507_v33 }
 0x1c5   :  { %2090 = vmatpush3.bf16.msra.mxu1 %v517_v49 }
 0x1c6   :  { %2091 = vmatprep.subr.bf16.mxu1 %v516_v50 }
 0x1c9   :  { %2092 = vmatpush3.bf16.msra.mxu1 %v516_v50 }
 0x1ca   :  { %2093 = vmatprep.subr.bf16.mxu1 %v515_v51 }
 0x1cd   :  { %2094 = vmatpush3.bf16.msra.mxu1 %v515_v51 }
 0x1ce   :  { %2095 = vmatprep.subr.bf16.mxu1 %v514_v52 }
 0x1d1   :  { %2096 = vmatpush3.bf16.msra.mxu1 %v514_v52 }
 0x1d2   :  { %2097 = vmatprep.subr.bf16.mxu1 %v513_v53 }
 0x1d5   :  { %2098 = vmatpush3.bf16.msra.mxu1 %v513_v53 }
 0x1d6   :  { %2099 = vmatprep.subr.bf16.mxu1 %v512_v54 }
 0x1d9   :  { %2100 = vmatpush3.bf16.msra.mxu1 %v512_v54 }
 0x1da   :  { %2101 = vmatprep.subr.bf16.mxu1 %v511_v20 }
 0x1dd   :  { %2102 = vmatpush3.bf16.msra.mxu1 %v511_v20 }
 0x1de   :  { %2103 = vmatprep.subr.bf16.mxu1 %v510_v15 }
 0x1e1   :  { %2104 = vmatpush3.bf16.msra.mxu1 %v510_v15 }
 0x1e2   :  { %932 = vmatprep.subr.bf16.mxu1 %v2281_v8 }
 0x1e4   :  { %2106 = vmatmul.mubr.bf16.vlgmr.msra.gmra.mxu1 %v2901_v55 }
 0x1e5   :  { %2109 = vmatprep.mubr.bf16.mxu1 %v2906_v56  ;;  %933 = vmatpush1.bf16.msra.mxu1 %v2279_v9 }
 0x1e6   :  { %934 = vmatprep.subr.bf16.mxu1 %v2284_v11 }
 0x1e9   :  { %935 = vmatpush1.bf16.msra.mxu1 %v2282_v12 }
 0x1ec   :  { %2110 = vmatmul.mubr.bf16.gmra.mxu1 %v2913_v57 }
 0x1ed   :  { %2113 = vmatprep.mubr.bf16.mxu1 %v2918_v58 }
 0x1f4   :  { %2114 = vmatmul.mubr.bf16.gmra.mxu1 %v2925_v59 }
 0x1f5   :  { %2117 = vmatprep.mubr.bf16.mxu1 %v2930_v60 }
 0x1fc   :  { %2118 = vmatmul.mubr.bf16.gmra.mxu1 %v2937_v61 }
 0x1fd   :  { %952 = vmatprep.mubr.bf16.mxu1 %v2631_v0 }
 0x2a4   :  { %v2107_v63 = vpop.f32.mrf.mxu1 }
 0x2a5   :  { %v2945_v2 = vmul.f32 %v2107_v63, %v526_v62 }
 0x2a6   :  { %v622_v3 = vpop.f32.mrf.mxu1 }
 0x2a7   :  { %v2947_v4 = vmul.f32 %v622_v3, %v524_v1  ;;  %705 = vrot.lane.b32.xlu0 %v2945_v2, %s2632_s30 }
 0x2a8   :  { %v2108_v5 = vpop.f32.mrf.mxu1 }
 0x2a9   :  { %749 = vrot.lane.b32.xlu1 %v2947_v4, %s2618_s26  ;;  %v2955_v7 = vmul.f32 %v2108_v5, %v527_v6 }
 0x2aa   :  { %v625_v10 = vpop.f32.mrf.mxu1 }
 0x2ab   :  { %753 = vrot.lane.b32.xlu0 %v2945_v2, %s2618_s26  ;;  %v2983_v15 = vmul.f32 %v625_v10, %v525_v14 }
 0x2ac   :  { %v2111_v13 = vpop.f32.mrf.mxu1 }
 0x2ad   :  { %707 = vrot.lane.b32.xlu1 %v2955_v7, %s2632_s30  ;;  %v2995_v20 = vmul.f32 %v2111_v13, %v530_v18  ;;  %v3112_v18 = vld [vmem:[#allocation5] ss:$0 sm:$0xff] }
 0x2ae   :  { %v638_v17 = vpop.f32.mrf.mxu1 }
 0x2af   :  { %801 = vrot.lane.b32.xlu0 %v2945_v2, %s2633_s1  ;;  %v3015_v27 = vmul.f32 %v638_v17, %v528_v22 }
 0x2b0   :  { %v2112_v16 = vpop.f32.mrf.mxu1 }
 0x2b1   :  { %755 = vrot.lane.b32.xlu1 %v2955_v7, %s2618_s26  ;;  %v2999_v21 = vmul.f32 %v2112_v16, %v531_v19 }
 0x2b2   :  { %v641_v24 = vpop.f32.mrf.mxu1 }
 0x2b3   :  { %701 = vrot.lane.b32.xlu0 %v2947_v4, %s2632_s30  ;;  %v3019_v28 = vmul.f32 %v641_v24, %v529_v26 }
 0x2b4   :  { %v2115_v29 = vpop.f32.mrf.mxu1 }
 0x2b5   :  { %803 = vrot.lane.b32.xlu1 %v2955_v7, %s2633_s1  ;;  %v3035_v34 = vmul.f32 %v2115_v29, %v534_v25 }
 0x2b6   :  { %v654_v23 = vpop.f32.mrf.mxu1 }
 0x2b7   :  { %797 = vrot.lane.b32.xlu0 %v2947_v4, %s2633_s1  ;;  %v3055_v40 = vmul.f32 %v654_v23, %v532_v35 }
 0x2b8   :  { %v2116_v30 = vpop.f32.mrf.mxu1 }
 0x2b9   :  { %751 = vrot.lane.b32.xlu1 %v2983_v15, %s2618_s26  ;;  %v3039_v36 = vmul.f32 %v2116_v30, %v535_v32 }
 0x2ba   :  { %v657_v37 = vpop.f32.mrf.mxu1 }
 0x2bb   :  { %703 = vrot.lane.b32.xlu0 %v2983_v15, %s2632_s30  ;;  %v3059_v42 = vmul.f32 %v657_v37, %v533_v38 }
 0x2bc   :  { %v2119_v43 = vpop.f32.mrf.mxu1 }
 0x2bd   :  { %799 = vrot.lane.b32.xlu1 %v2983_v15, %s2633_s1  ;;  %v3073_v48 = vmul.f32 %v2119_v43, %v2896_v47 }
 0x2be   :  { %v670_v31 = vpop.f32.mrf.mxu1 }
 0x2bf   :  { %713 = vrot.lane.b32.xlu0 %v2995_v20, %s2632_s30  ;;  %v3082_v51 = vmul.f32 %v670_v31, %v2890_v41 }
 0x2c0   :  { %v2120_v45 = vpop.f32.mrf.mxu1 }
 0x2c1   :  { %715 = vrot.lane.b32.xlu1 %v2999_v21, %s2632_s30  ;;  %v3077_v49 = vmul.f32 %v2120_v45, %v539_v46 }
 0x2c2   :  { %v673_v50 = vpop.f32.mrf.mxu1 }
 0x2c3   :  { %761 = vrot.lane.b32.xlu0 %v2995_v20, %s2618_s26  ;;  %v3087_v39 = vmul.f32 %v673_v50, %v2893_v44 }
 0x2c5   :  { %763 = vrot.lane.b32.xlu1 %v2999_v21, %s2618_s26 }
 0x2c7   :  { %809 = vrot.lane.b32.xlu0 %v2995_v20, %s2633_s1 }
 0x2c9   :  { %811 = vrot.lane.b32.xlu1 %v2999_v21, %s2633_s1 }
 0x2cb   :  { %709 = vrot.lane.b32.xlu0 %v3015_v27, %s2632_s30 }
 0x2cd   :  { %711 = vrot.lane.b32.xlu1 %v3019_v28, %s2632_s30 }
 0x2cf   :  { %757 = vrot.lane.b32.xlu0 %v3015_v27, %s2618_s26 }
 0x2d1   :  { %759 = vrot.lane.b32.xlu1 %v3019_v28, %s2618_s26 }
 0x2d3   :  { %805 = vrot.lane.b32.xlu0 %v3015_v27, %s2633_s1 }
 0x2d5   :  { %807 = vrot.lane.b32.xlu1 %v3019_v28, %s2633_s1 }
 0x2d7   :  { %721 = vrot.lane.b32.xlu0 %v3035_v34, %s2632_s30 }
 0x2d9   :  { %723 = vrot.lane.b32.xlu1 %v3039_v36, %s2632_s30 }
 0x2db   :  { %769 = vrot.lane.b32.xlu0 %v3035_v34, %s2618_s26 }
 0x2dd   :  { %771 = vrot.lane.b32.xlu1 %v3039_v36, %s2618_s26 }
 0x2df   :  { %817 = vrot.lane.b32.xlu0 %v3035_v34, %s2633_s1 }
 0x2e1   :  { %819 = vrot.lane.b32.xlu1 %v3039_v36, %s2633_s1 }
 0x2e3   :  { %717 = vrot.lane.b32.xlu0 %v3055_v40, %s2632_s30 }
 0x2e5   :  { %719 = vrot.lane.b32.xlu1 %v3059_v42, %s2632_s30 }
 0x2e7   :  { %765 = vrot.lane.b32.xlu0 %v3055_v40, %s2618_s26 }
 0x2e9   :  { %767 = vrot.lane.b32.xlu1 %v3059_v42, %s2618_s26 }
 0x2eb   :  { %813 = vrot.lane.b32.xlu0 %v3055_v40, %s2633_s1 }
 0x2ed   :  { %815 = vrot.lane.b32.xlu1 %v3059_v42, %s2633_s1 }
 0x2ef   :  { %729 = vrot.lane.b32.xlu0 %v3073_v48, %s2632_s30 }
 0x2f1   :  { %731 = vrot.lane.b32.xlu1 %v3077_v49, %s2632_s30 }
 0x2f3   :  { %725 = vrot.lane.b32.xlu0 %v3082_v51, %s2632_s30 }
 0x2f5   :  { %727 = vrot.lane.b32.xlu1 %v3087_v39, %s2632_s30 }
 0x2f7   :  { %773 = vrot.lane.b32.xlu0 %v3082_v51, %s2618_s26 }
 0x2f9   :  { %775 = vrot.lane.b32.xlu1 %v3087_v39, %s2618_s26 }
 0x2fb   :  { %821 = vrot.lane.b32.xlu0 %v3082_v51, %s2633_s1 }
 0x2fd   :  { %823 = vrot.lane.b32.xlu1 %v3087_v39, %s2633_s1 }
 0x2ff   :  { %777 = vrot.lane.b32.xlu0 %v3073_v48, %s2618_s26 }
 0x301   :  { %779 = vrot.lane.b32.xlu1 %v3077_v49, %s2618_s26 }
 0x303   :  { %825 = vrot.lane.b32.xlu0 %v3073_v48, %s2633_s1 }
 0x305   :  { %827 = vrot.lane.b32.xlu1 %v3077_v49, %s2633_s1 }
 0x319   :  { %v706_v41 = vpop.permute.xlu0 %705 }
 0x31a   :  { %v735_v19 = vadd.f32 %v706_v41, %v2945_v2 }
 0x31b   :  { %v750_v44 = vpop.permute.xlu1 %749 }
 0x31d   :  { %v754_v47 = vpop.permute.xlu0 %753 }
 0x31f   :  { %v708_v52 = vpop.permute.xlu1 %707 }
 0x320   :  { %v736_v14 = vadd.f32 %v708_v52, %v2955_v7 }
 0x321   :  { %v802_v53 = vpop.permute.xlu0 %801 }
 0x323   :  { %v756_v54 = vpop.permute.xlu1 %755 }
 0x324   :  { %v784_v22 = vadd.f32 %v756_v54, %v736_v14 }
 0x325   :  { %v702_v62 = vpop.permute.xlu0 %701 }
 0x326   :  { %v733_v1 = vadd.f32 %v702_v62, %v2947_v4 }
 0x327   :  { %v804_v63 = vpop.permute.xlu1 %803 }
 0x328   :  { %v781_v6 = vadd.f32 %v750_v44, %v733_v1  ;;  %v832_v29 = vadd.f32 %v804_v63, %v784_v22 }
 0x329   :  { %v798_v3 = vpop.permute.xlu0 %797 }
 0x32a   :  { %v829_v11 = vadd.f32 %v798_v3, %v781_v6  ;;  %v854_v32 = vadd.f32 %v3112_v18, %v832_v29 }
 0x32b   :  { %v752_v5 = vpop.permute.xlu1 %751 }
 0x32c   :  { %v851_v4 = vadd.f32 %v3112_v18, %v829_v11 }
 0x32d   :  { %v704_v8 = vpop.permute.xlu0 %703 }
 0x32e   :  { %v734_v9 = vadd.f32 %v704_v8, %v2983_v15  ;;  %v783_v15 = vadd.f32 %v754_v47, %v735_v19 }
 0x32f   :  { %v800_v10 = vpop.permute.xlu1 %799 }
 0x330   :  { %v782_v12 = vadd.f32 %v752_v5, %v734_v9  ;;  %v831_v30 = vadd.f32 %v802_v53, %v783_v15 }
 0x331   :  { %v714_v13 = vpop.permute.xlu0 %713 }
 0x332   :  { %v830_v17 = vadd.f32 %v800_v10, %v782_v12  ;;  %v853_v35 = vadd.f32 %v3112_v18, %v831_v30  ;;  %v739_v63 = vadd.f32 %v714_v13, %v2995_v20 }
 0x333   :  { %v716_v16 = vpop.permute.xlu1 %715 }
 0x334   :  { %v852_v24 = vadd.f32 %v3112_v18, %v830_v17  ;;  %v868_v38 = vpack.c.bf16 %v854_v32, %v853_v35  ;;  %v740_v53 = vadd.f32 %v716_v16, %v2999_v21 }
 0x335   :  { %v762_v26 = vpop.permute.xlu0 %761 }
 0x336   :  { %v867_v23 = vpack.c.bf16 %v852_v24, %v851_v4  ;;  %v787_v6 = vadd.f32 %v762_v26, %v739_v63 }
 0x337   :  { %v764_v25 = vpop.permute.xlu1 %763 }
 0x338   :  { %1979 = vmatmul.mubr.msk.bf16.vlgmr.msra.gmra.mxu1 %vm895_vm1, %v867_v23  ;;  %v788_v1 = vadd.f32 %v764_v25, %v740_v53 }
 0x339   :  { %v810_v7 = vpop.permute.xlu0 %809  ;;  %962 = vmatprep.mubr.bf16.mxu1 %v2631_v0 }
 0x33a   :  { %v835_v10 = vadd.f32 %v810_v7, %v787_v6 }
 0x33b   :  { %v812_v2 = vpop.permute.xlu1 %811 }
 0x33c   :  { %v836_v8 = vadd.f32 %v812_v2, %v788_v1  ;;  %v857_v20 = vadd.f32 %v3112_v18, %v835_v10 }
 0x33d   :  { %v710_v37 = vpop.permute.xlu0 %709 }
 0x33e   :  { %v737_v33 = vadd.f32 %v710_v37, %v3015_v27  ;;  %v858_v21 = vadd.f32 %v3112_v18, %v836_v8 }
 0x33f   :  { %v712_v43 = vpop.permute.xlu1 %711 }
 0x340   :  { %1980 = vmatmul.mubr.msk.bf16.gmra.mxu1 %vm895_vm1, %v868_v38  ;;  %v738_v46 = vadd.f32 %v712_v43, %v3019_v28  ;;  %v870_v14 = vpack.c.bf16 %v858_v21, %v857_v20 }
 0x341   :  { %v758_v31 = vpop.permute.xlu0 %757  ;;  %972 = vmatprep.mubr.bf16.mxu1 %v2631_v0 }
 0x342   :  { %v785_v50 = vadd.f32 %v758_v31, %v737_v33 }
 0x343   :  { %v760_v45 = vpop.permute.xlu1 %759 }
 0x344   :  { %v786_v44 = vadd.f32 %v760_v45, %v738_v46 }
 0x345   :  { %v806_v41 = vpop.permute.xlu0 %805 }
 0x346   :  { %v833_v47 = vadd.f32 %v806_v41, %v785_v50 }
 0x347   :  { %v808_v52 = vpop.permute.xlu1 %807 }
 0x348   :  { %v834_v54 = vadd.f32 %v808_v52, %v786_v44  ;;  %v855_v3 = vadd.f32 %v3112_v18, %v833_v47 }
 0x349   :  { %v722_v62 = vpop.permute.xlu0 %721 }
 0x34a   :  { %v856_v5 = vadd.f32 %v3112_v18, %v834_v54  ;;  %v743_v2 = vadd.f32 %v722_v62, %v3035_v34 }
 0x34b   :  { %v724_v27 = vpop.permute.xlu1 %723 }
 0x34c   :  { %v869_v28 = vpack.c.bf16 %v856_v5, %v855_v3  ;;  %v744_v30 = vadd.f32 %v724_v27, %v3039_v36 }
 0x34d   :  { %v770_v9 = vpop.permute.xlu0 %769 }
 0x34e   :  { %1981 = vmatmul.mubr.msk.bf16.gmra.mxu1 %vm895_vm1, %v869_v28  ;;  %v791_v43 = vadd.f32 %v770_v9, %v743_v2 }
 0x34f   :  { %v772_v11 = vpop.permute.xlu1 %771  ;;  %982 = vmatprep.mubr.bf16.mxu1 %v2631_v0 }
 0x350   :  { %v792_v35 = vadd.f32 %v772_v11, %v744_v30 }
 0x351   :  { %v818_v12 = vpop.permute.xlu0 %817 }
 0x352   :  { %v839_v45 = vadd.f32 %v818_v12, %v791_v43 }
 0x353   :  { %v820_v13 = vpop.permute.xlu1 %819 }
 0x354   :  { %v840_v31 = vadd.f32 %v820_v13, %v792_v35  ;;  %v861_v34 = vadd.f32 %v3112_v18, %v839_v45 }
 0x355   :  { %v718_v17 = vpop.permute.xlu0 %717 }
 0x356   :  { %1982 = vmatmul.mubr.msk.bf16.gmra.mxu1 %vm895_vm1, %v870_v14  ;;  %v741_v22 = vadd.f32 %v718_v17, %v3055_v40  ;;  %v862_v36 = vadd.f32 %v3112_v18, %v840_v31 }
 0x357   :  { %v720_v16 = vpop.permute.xlu1 %719  ;;  %992 = vmatprep.mubr.bf16.mxu1 %v2631_v0 }
 0x358   :  { %v742_v24 = vadd.f32 %v720_v16, %v3059_v42  ;;  %v872_v47 = vpack.c.bf16 %v862_v36, %v861_v34 }
 0x359   :  { %v766_v19 = vpop.permute.xlu0 %765 }
 0x35a   :  { %v789_v26 = vadd.f32 %v766_v19, %v741_v22 }
 0x35b   :  { %v768_v4 = vpop.permute.xlu1 %767 }
 0x35c   :  { %v790_v29 = vadd.f32 %v768_v4, %v742_v24 }
 0x35d   :  { %v814_v15 = vpop.permute.xlu0 %813 }
 0x35e   :  { %v837_v23 = vadd.f32 %v814_v15, %v789_v26 }
 0x35f   :  { %v816_v25 = vpop.permute.xlu1 %815 }
 0x360   :  { %v838_v7 = vadd.f32 %v816_v25, %v790_v29  ;;  %v859_v37 = vadd.f32 %v3112_v18, %v837_v23 }
 0x361   :  { %v730_v32 = vpop.permute.xlu0 %729 }
 0x362   :  { %v860_v38 = vadd.f32 %v3112_v18, %v838_v7  ;;  %v747_v27 = vadd.f32 %v730_v32, %v3073_v48 }
 0x363   :  { %v732_v40 = vpop.permute.xlu1 %731 }
 0x364   :  { %v871_v42 = vpack.c.bf16 %v860_v38, %v859_v37 }
 0x365   :  { %v726_v33 = vpop.permute.xlu0 %725 }
 0x366   :  { %1983 = vmatmul.mubr.msk.bf16.gmra.mxu1 %vm895_vm1, %v871_v42  ;;  %v745_v41 = vadd.f32 %v726_v33, %v3082_v51 }
 0x367   :  { %v728_v46 = vpop.permute.xlu1 %727  ;;  %1002 = vmatprep.mubr.bf16.mxu1 %v2631_v0 }
 0x368   :  { %v746_v52 = vadd.f32 %v728_v46, %v3087_v39  ;;  %v748_v39 = vadd.f32 %v732_v40, %v3077_v49 }
 0x369   :  { %v774_v50 = vpop.permute.xlu0 %773 }
 0x36a   :  { %v793_v53 = vadd.f32 %v774_v50, %v745_v41 }
 0x36b   :  { %v776_v44 = vpop.permute.xlu1 %775 }
 0x36c   :  { %v794_v62 = vadd.f32 %v776_v44, %v746_v52 }
 0x36d   :  { %v822_v54 = vpop.permute.xlu0 %821 }
 0x36e   :  { %v841_v63 = vadd.f32 %v822_v54, %v793_v53  ;;  %1984 = vmatmul.mubr.msk.bf16.gmra.mxu1 %vm895_vm1, %v872_v47 }
 0x36f   :  { %v824_v1 = vpop.permute.xlu1 %823  ;;  %1012 = vmatprep.mubr.bf16.mxu1 %v2631_v0 }
 0x370   :  { %v842_v3 = vadd.f32 %v824_v1, %v794_v62  ;;  %v863_v6 = vadd.f32 %v3112_v18, %v841_v63  ;;  %v3191_v1 = vld [vmem:[#allocation7] ss:$0 sm:$0xff] }
 0x371   :  { %v778_v5 = vpop.permute.xlu0 %777 }
 0x372   :  { %v864_v51 = vadd.f32 %v3112_v18, %v842_v3  ;;  %v795_v9 = vadd.f32 %v778_v5, %v747_v27 }
 0x373   :  { %v780_v8 = vpop.permute.xlu1 %779 }
 0x374   :  { %v873_v28 = vpack.c.bf16 %v864_v51, %v863_v6  ;;  %v796_v11 = vadd.f32 %v780_v8, %v748_v39  ;;  %v2286_v8 = vld [vmem:[%s3513_s9] sm:$0xff]  }
 0x375   :  { %v826_v10 = vpop.permute.xlu0 %825 }
 0x376   :  { %v843_v21 = vadd.f32 %v826_v10, %v795_v9  ;;  %1985 = vmatmul.mubr.msk.bf16.gmra.mxu1 %vm895_vm1, %v873_v28 }
 0x377   :  { %v828_v12 = vpop.permute.xlu1 %827  ;;  %1022 = vmatprep.mubr.bf16.mxu1 %v2631_v0 }
 0x378   :  { %v844_v20 = vadd.f32 %v828_v12, %v796_v11  ;;  %v865_v48 = vadd.f32 %v3112_v18, %v843_v21 }
 0x37a   :  { %v866_v13 = vadd.f32 %v3112_v18, %v844_v20 }
 0x37c   :  { %v874_v14 = vpack.c.bf16 %v866_v13, %v865_v48 }
 0x37e   :  { %1986 = vmatmul.mubr.msk.bf16.gmra.mxu1 %vm895_vm1, %v874_v14 }
 0x3f8   :  { %v954_v17 = vpop.f32.mrf.mxu1 }
 0x3fa   :  { %v3158_v49 = vpop.f32.mrf.mxu1 }
 0x3fc   :  { %v958_v16 = vpop.f32.mrf.mxu1 }
 0x3fd   :  { %v1033_v19 = vpack.c.bf16 %v958_v16, %v954_v17 }
 0x3fe   :  { %v3160_v22 = vpop.f32.mrf.mxu1 }
 0x3ff   :  { %v1048_v51 = vadd.f32 %v3191_v1, %v3160_v22 }
 0x400   :  { %v964_v4 = vpop.f32.mrf.mxu1 }
 0x402   :  { %v966_v24 = vpop.f32.mrf.mxu1 }
 0x403   :  { %v1049_v3 = vadd.f32 %v3191_v1, %v966_v24 }
 0x404   :  { %v968_v26 = vpop.f32.mrf.mxu1 }
 0x405   :  { %v1034_v15 = vpack.c.bf16 %v968_v26, %v964_v4 }
 0x406   :  { %v970_v0 = vpop.f32.mrf.mxu1 }
 0x40e   :  { %v974_v29 = vpop.f32.mrf.mxu1 }
 0x410   :  { %v3162_v23 = vpop.f32.mrf.mxu1 }
 0x411   :  { %v1051_v48 = vadd.f32 %v3191_v1, %v3162_v23 }
 0x412   :  { %v978_v25 = vpop.f32.mrf.mxu1 }
 0x413   :  { %v1035_v63 = vpack.c.bf16 %v978_v25, %v974_v29 }
 0x414   :  { %v3164_v18 = vpop.f32.mrf.mxu1 }
 0x415   :  { %v1052_v17 = vadd.f32 %v3191_v1, %v3164_v18 }
 0x416   :  { %v984_v30 = vpop.f32.mrf.mxu1 }
 0x418   :  { %v3166_v7 = vpop.f32.mrf.mxu1 }
 0x419   :  { %v1053_v10 = vadd.f32 %v3191_v1, %v3166_v7 }
 0x41a   :  { %v988_v32 = vpop.f32.mrf.mxu1 }
 0x41b   :  { %v1036_v62 = vpack.c.bf16 %v988_v32, %v984_v30 }
 0x41c   :  { %v3168_v2 = vpop.f32.mrf.mxu1 }
 0x41d   :  { %v1054_v12 = vadd.f32 %v3191_v1, %v3168_v2 }
 0x426   :  { %v994_v35 = vpop.f32.mrf.mxu1 }
 0x428   :  { %v3170_v37 = vpop.f32.mrf.mxu1 }
 0x42a   :  { %v998_v38 = vpop.f32.mrf.mxu1 }
 0x42b   :  { %v1037_v54 = vpack.c.bf16 %v998_v38, %v994_v35 }
 0x42c   :  { %v3172_v40 = vpop.f32.mrf.mxu1 }
 0x42d   :  { %v1056_v25 = vadd.f32 %v3191_v1, %v3172_v40 }
 0x42e   :  { %v1004_v43 = vpop.f32.mrf.mxu1 }
 0x430   :  { %v3174_v31 = vpop.f32.mrf.mxu1 }
 0x431   :  { %v1057_v22 = vadd.f32 %v3191_v1, %v3174_v31 }
 0x432   :  { %v1008_v42 = vpop.f32.mrf.mxu1 }
 0x433   :  { %v1038_v53 = vpack.c.bf16 %v1008_v42, %v1004_v43 }
 0x434   :  { %v3176_v33 = vpop.f32.mrf.mxu1 }
 0x435   :  { %v1058_v26 = vadd.f32 %v3191_v1, %v3176_v33 }
 0x436   :  { %v1014_v45 = vpop.f32.mrf.mxu1 }
 0x438   :  { %v3178_v46 = vpop.f32.mrf.mxu1 }
 0x439   :  { %v1059_v43 = vadd.f32 %v3191_v1, %v3178_v46  ;;  %v2634_v46 = vmov 0.0  }
 0x43a   :  { %v1018_v36 = vpop.f32.mrf.mxu1  ;;  %2173 = vmatprep.subr.bf16.mxu1 %v2634_v46  ;;  %2189 = vmatprep.mubr.msk.bf16.mxu1 %vm2635_vm2, %v2634_v46 }
 0x43b   :  { %v1039_v52 = vpack.c.bf16 %v1018_v36, %v1014_v45 }
 0x43c   :  { %v3180_v50 = vpop.f32.mrf.mxu1 }
 0x43d   :  { %v1060_v33 = vadd.f32 %v3191_v1, %v3180_v50 }
 0x43e   :  { %v1024_v34 = vpop.f32.mrf.mxu1 }
 0x440   :  { %v3182_v41 = vpop.f32.mrf.mxu1 }
 0x441   :  { %v1061_v32 = vadd.f32 %v3191_v1, %v3182_v41 }
 0x442   :  { %v1028_v44 = vpop.f32.mrf.mxu1 }
 0x443   :  { %v1040_v47 = vpack.c.bf16 %v1028_v44, %v1024_v34 }
 0x444   :  { %v1030_v2 = vpop.f32.mrf.mxu1 }
 0x445   :  { %2121 = vmatprep.subr.bf16.mxu0 %v1040_v47  ;;  %v1062_v38 = vadd.f32 %v3191_v1, %v1030_v2 }
 0x446   :  { %2122 = vmatpush3.bf16.msra.mxu0 %v1040_v47 }
 0x447   :  { %2123 = vmatprep.subr.bf16.mxu0 %v1039_v52 }
 0x44a   :  { %2124 = vmatpush3.bf16.msra.mxu0 %v1039_v52 }
 0x44b   :  { %2125 = vmatprep.subr.bf16.mxu0 %v1038_v53 }
 0x44e   :  { %2126 = vmatpush3.bf16.msra.mxu0 %v1038_v53 }
 0x44f   :  { %2127 = vmatprep.subr.bf16.mxu0 %v1037_v54 }
 0x452   :  { %2128 = vmatpush3.bf16.msra.mxu0 %v1037_v54 }
 0x453   :  { %2129 = vmatprep.subr.bf16.mxu0 %v1036_v62 }
 0x456   :  { %2130 = vmatpush3.bf16.msra.mxu0 %v1036_v62 }
 0x457   :  { %2131 = vmatprep.subr.bf16.mxu0 %v1035_v63 }
 0x45a   :  { %2132 = vmatpush3.bf16.msra.mxu0 %v1035_v63 }
 0x45b   :  { %2133 = vmatprep.subr.bf16.mxu0 %v1034_v15 }
 0x45e   :  { %2134 = vmatpush3.bf16.msra.mxu0 %v1034_v15 }
 0x45f   :  { %2135 = vmatprep.subr.bf16.mxu0 %v1033_v19 }
 0x462   :  { %2136 = vmatpush3.bf16.msra.mxu0 %v1033_v19 }
 0x465   :  { %2138 = vmatmul.mubr.bf16.vlgmr.msra.gmra.mxu0 %v2901_v55 }
 0x466   :  { %2141 = vmatprep.mubr.bf16.mxu0 %v2906_v56  ;;  %v1050_v56 = vadd.f32 %v3191_v1, %v970_v0  ;;  %v1055_v0 = vadd.f32 %v3191_v1, %v3170_v37 }
 0x46d   :  { %2142 = vmatmul.mubr.bf16.gmra.mxu0 %v2913_v57 }
 0x46e   :  { %2145 = vmatprep.mubr.bf16.mxu0 %v2918_v58 }
 0x475   :  { %2146 = vmatmul.mubr.bf16.gmra.mxu0 %v2925_v59  ;;  %v1047_v59 = vadd.f32 %v3191_v1, %v3158_v49 }
 0x476   :  { %2149 = vmatprep.mubr.bf16.mxu0 %v2930_v60  ;;  %v2285_v60 = vld [vmem:[%s3513_s9 + $0x8] sm:$0xff]  }
 0x477   :  { %2153 = vmatprep.subr.bf16.mxu0 %v2285_v60 }
 0x478   :  { %2154 = vmatpush3.bf16.msra.mxu0 %v2285_v60 }
 0x479   :  { %2155 = vmatprep.subr.bf16.mxu0 %v2286_v8 }
 0x47c   :  { %2156 = vmatpush3.bf16.msra.mxu0 %v2286_v8 }
 0x47d   :  { %2150 = vmatmul.mubr.bf16.gmra.mxu0 %v2937_v61  ;;  %2193 = vmatprep.subr.bf16.mxu0 %v2634_v46 }
 0x525   :  { %v2139_v5 = vpop.f32.mrf.mxu0 }
 0x526   :  { %v3194_v27 = vmul.f32 %v2139_v5, %v1049_v3 }
 0x527   :  { %v1097_v55 = vpop.f32.mrf.mxu0 }
 0x528   :  { %1180 = vrot.lane.b32.xlu0 %v3194_v27, %s2632_s30  ;;  %v3214_v61 = vmul.f32 %v1097_v55, %v1047_v59 }
 0x529   :  { %v2140_v57 = vpop.f32.mrf.mxu0 }
 0x52a   :  { %v3199_v58 = vmul.f32 %v2140_v57, %v1050_v56 }
 0x52b   :  { %v1100_v6 = vpop.f32.mrf.mxu0 }
 0x52c   :  { %1228 = vrot.lane.b32.xlu0 %v3194_v27, %s2618_s26  ;;  %1182 = vrot.lane.b32.xlu1 %v3199_v58, %s2632_s30  ;;  %v3225_v39 = vmul.f32 %v1100_v6, %v1048_v51 }
 0x52d   :  { %v2143_v28 = vpop.f32.mrf.mxu0 }
 0x52e   :  { %v3237_v11 = vmul.f32 %v2143_v28, %v1053_v10  ;;  %v3364_v10 = vld [vmem:[#allocation8] ss:$0 sm:$0xff] }
 0x52f   :  { %v1113_v9 = vpop.f32.mrf.mxu0 }
 0x530   :  { %1276 = vrot.lane.b32.xlu0 %v3194_v27, %s2633_s1  ;;  %1230 = vrot.lane.b32.xlu1 %v3199_v58, %s2618_s26  ;;  %v3257_v13 = vmul.f32 %v1113_v9, %v1051_v48 }
 0x531   :  { %v2144_v21 = vpop.f32.mrf.mxu0 }
 0x532   :  { %v3245_v20 = vmul.f32 %v2144_v21, %v1054_v12 }
 0x533   :  { %v1116_v14 = vpop.f32.mrf.mxu0 }
 0x534   :  { %1176 = vrot.lane.b32.xlu0 %v3214_v61, %s2632_s30  ;;  %1278 = vrot.lane.b32.xlu1 %v3199_v58, %s2633_s1  ;;  %v3265_v49 = vmul.f32 %v1116_v14, %v1052_v17  ;;  %v2287_v17 = vld [vmem:[#allocation11] sm:$0xff]  }
 0x535   :  { %v2147_v16 = vpop.f32.mrf.mxu0 }
 0x536   :  { %v3277_v4 = vmul.f32 %v2147_v16, %v1057_v22 }
 0x537   :  { %v1129_v19 = vpop.f32.mrf.mxu0 }
 0x538   :  { %1224 = vrot.lane.b32.xlu0 %v3214_v61, %s2618_s26  ;;  %1178 = vrot.lane.b32.xlu1 %v3225_v39, %s2632_s30  ;;  %v3297_v29 = vmul.f32 %v1129_v19, %v1055_v0 }
 0x539   :  { %v2148_v24 = vpop.f32.mrf.mxu0 }
 0x53a   :  { %v3285_v15 = vmul.f32 %v2148_v24, %v1058_v26 }
 0x53b   :  { %v1132_v23 = vpop.f32.mrf.mxu0 }
 0x53c   :  { %1272 = vrot.lane.b32.xlu0 %v3214_v61, %s2633_s1  ;;  %1226 = vrot.lane.b32.xlu1 %v3225_v39, %s2618_s26  ;;  %v3305_v18 = vmul.f32 %v1132_v23, %v1056_v25 }
 0x53d   :  { %v2151_v30 = vpop.f32.mrf.mxu0 }
 0x53e   :  { %v3317_v35 = vmul.f32 %v2151_v30, %v1061_v32 }
 0x53f   :  { %v1145_v7 = vpop.f32.mrf.mxu0 }
 0x540   :  { %1274 = vrot.lane.b32.xlu1 %v3225_v39, %s2633_s1  ;;  %1188 = vrot.lane.b32.xlu0 %v3237_v11, %s2632_s30  ;;  %v3332_v31 = vmul.f32 %v1145_v7, %v1059_v43 }
 0x541   :  { %v2152_v37 = vpop.f32.mrf.mxu0 }
 0x542   :  { %v3324_v40 = vmul.f32 %v2152_v37, %v1062_v38 }
 0x543   :  { %v1148_v42 = vpop.f32.mrf.mxu0 }
 0x544   :  { %1236 = vrot.lane.b32.xlu0 %v3237_v11, %s2618_s26  ;;  %1190 = vrot.lane.b32.xlu1 %v3245_v20, %s2632_s30  ;;  %v3340_v45 = vmul.f32 %v1148_v42, %v1060_v33 }
 0x548   :  { %1284 = vrot.lane.b32.xlu0 %v3237_v11, %s2633_s1  ;;  %1238 = vrot.lane.b32.xlu1 %v3245_v20, %s2618_s26 }
 0x54c   :  { %1184 = vrot.lane.b32.xlu0 %v3257_v13, %s2632_s30  ;;  %1286 = vrot.lane.b32.xlu1 %v3245_v20, %s2633_s1 }
 0x550   :  { %1232 = vrot.lane.b32.xlu0 %v3257_v13, %s2618_s26  ;;  %1186 = vrot.lane.b32.xlu1 %v3265_v49, %s2632_s30 }
 0x554   :  { %1280 = vrot.lane.b32.xlu0 %v3257_v13, %s2633_s1  ;;  %1234 = vrot.lane.b32.xlu1 %v3265_v49, %s2618_s26 }
 0x558   :  { %1282 = vrot.lane.b32.xlu1 %v3265_v49, %s2633_s1  ;;  %1196 = vrot.lane.b32.xlu0 %v3277_v4, %s2632_s30 }
 0x55c   :  { %1244 = vrot.lane.b32.xlu0 %v3277_v4, %s2618_s26  ;;  %1198 = vrot.lane.b32.xlu1 %v3285_v15, %s2632_s30 }
 0x560   :  { %1292 = vrot.lane.b32.xlu0 %v3277_v4, %s2633_s1  ;;  %1246 = vrot.lane.b32.xlu1 %v3285_v15, %s2618_s26 }
 0x564   :  { %1192 = vrot.lane.b32.xlu0 %v3297_v29, %s2632_s30  ;;  %1294 = vrot.lane.b32.xlu1 %v3285_v15, %s2633_s1 }
 0x568   :  { %1240 = vrot.lane.b32.xlu0 %v3297_v29, %s2618_s26  ;;  %1194 = vrot.lane.b32.xlu1 %v3305_v18, %s2632_s30 }
 0x56c   :  { %1288 = vrot.lane.b32.xlu0 %v3297_v29, %s2633_s1  ;;  %1242 = vrot.lane.b32.xlu1 %v3305_v18, %s2618_s26 }
 0x570   :  { %1290 = vrot.lane.b32.xlu1 %v3305_v18, %s2633_s1  ;;  %1204 = vrot.lane.b32.xlu0 %v3317_v35, %s2632_s30 }
 0x574   :  { %1252 = vrot.lane.b32.xlu0 %v3317_v35, %s2618_s26  ;;  %1206 = vrot.lane.b32.xlu1 %v3324_v40, %s2632_s30 }
 0x578   :  { %1200 = vrot.lane.b32.xlu0 %v3332_v31, %s2632_s30  ;;  %1254 = vrot.lane.b32.xlu1 %v3324_v40, %s2618_s26 }
 0x57c   :  { %1248 = vrot.lane.b32.xlu0 %v3332_v31, %s2618_s26  ;;  %1202 = vrot.lane.b32.xlu1 %v3340_v45, %s2632_s30 }
 0x580   :  { %1296 = vrot.lane.b32.xlu0 %v3332_v31, %s2633_s1  ;;  %1250 = vrot.lane.b32.xlu1 %v3340_v45, %s2618_s26 }
 0x584   :  { %1300 = vrot.lane.b32.xlu0 %v3317_v35, %s2633_s1  ;;  %1298 = vrot.lane.b32.xlu1 %v3340_v45, %s2633_s1 }
 0x588   :  { %1302 = vrot.lane.b32.xlu1 %v3324_v40, %s2633_s1 }
 0x59a   :  { %v1181_v36 = vpop.permute.xlu0 %1180 }
 0x59b   :  { %v1210_v1 = vadd.f32 %v1181_v36, %v3194_v27 }
 0x59e   :  { %v1229_v50 = vpop.permute.xlu0 %1228  ;;  %v1183_v34 = vpop.permute.xlu1 %1182 }
 0x59f   :  { %v1211_v62 = vadd.f32 %v1183_v34, %v3199_v58  ;;  %v1258_v59 = vadd.f32 %v1229_v50, %v1210_v1 }
 0x5a2   :  { %v1277_v41 = vpop.permute.xlu0 %1276  ;;  %v1231_v44 = vpop.permute.xlu1 %1230 }
 0x5a3   :  { %v1259_v3 = vadd.f32 %v1231_v44, %v1211_v62  ;;  %v1306_v8 = vadd.f32 %v1277_v41, %v1258_v59 }
 0x5a5   :  { %v1328_v12 = vadd.f32 %v3364_v10, %v1306_v8 }
 0x5a6   :  { %v1177_v47 = vpop.permute.xlu0 %1176  ;;  %v1279_v52 = vpop.permute.xlu1 %1278 }
 0x5a7   :  { %v1208_v63 = vadd.f32 %v1177_v47, %v3214_v61  ;;  %v1307_v60 = vadd.f32 %v1279_v52, %v1259_v3 }
 0x5a9   :  { %v1329_v61 = vadd.f32 %v3364_v10, %v1307_v60 }
 0x5aa   :  { %v1225_v53 = vpop.permute.xlu0 %1224  ;;  %v1179_v54 = vpop.permute.xlu1 %1178 }
 0x5ab   :  { %v1256_v56 = vadd.f32 %v1225_v53, %v1208_v63  ;;  %v1209_v57 = vadd.f32 %v1179_v54, %v3225_v39  ;;  %v1343_v16 = vpack.c.bf16 %v1329_v61, %v1328_v12 }
 0x5ae   :  { %v1273_v5 = vpop.permute.xlu0 %1272  ;;  %v1227_v55 = vpop.permute.xlu1 %1226 }
 0x5af   :  { %v1304_v6 = vadd.f32 %v1273_v5, %v1256_v56  ;;  %v1257_v51 = vadd.f32 %v1227_v55, %v1209_v57 }
 0x5b1   :  { %v1326_v27 = vadd.f32 %v3364_v10, %v1304_v6 }
 0x5b2   :  { %v1275_v28 = vpop.permute.xlu1 %1274  ;;  %v1189_v9 = vpop.permute.xlu0 %1188 }
 0x5b3   :  { %v1305_v58 = vadd.f32 %v1275_v28, %v1257_v51  ;;  %v1214_v7 = vadd.f32 %v1189_v9, %v3237_v11 }
 0x5b5   :  { %v1327_v21 = vadd.f32 %v3364_v10, %v1305_v58 }
 0x5b6   :  { %v1237_v48 = vpop.permute.xlu0 %1236  ;;  %v1191_v39 = vpop.permute.xlu1 %1190 }
 0x5b7   :  { %v1342_v14 = vpack.c.bf16 %v1327_v21, %v1326_v27  ;;  %v1215_v25 = vadd.f32 %v1191_v39, %v3245_v20  ;;  %v1262_v42 = vadd.f32 %v1237_v48, %v1214_v7 }
 0x5b9   :  { %2157 = vmatprep.mubr.msk.bf16.mxu0 %vm895_vm1, %v1342_v14 }
 0x5ba   :  { %2158 = vmatmul.mubr.msk.bf16.vlgmr.msra.gmra.mxu0 %vm895_vm1, %v1343_v16  ;;  %v1285_v19 = vpop.permute.xlu0 %1284  ;;  %v1239_v22 = vpop.permute.xlu1 %1238 }
 0x5bb   :  { %2194 = vmatpush3.bf16.msra.mxu0 %v2287_v17  ;;  %v1263_v32 = vadd.f32 %v1239_v22, %v1215_v25  ;;  %v1310_v34 = vadd.f32 %v1285_v19, %v1262_v42 }
 0x5bc   :  { %2207 = vmatprep.subr.bf16.mxu0 %v2634_v46 }
 0x5bd   :  { %v1332_v52 = vadd.f32 %v3364_v10, %v1310_v34 }
 0x5be   :  { %v1185_v24 = vpop.permute.xlu0 %1184  ;;  %v1287_v26 = vpop.permute.xlu1 %1286 }
 0x5bf   :  { %v1212_v30 = vadd.f32 %v1185_v24, %v3257_v13  ;;  %v1311_v33 = vadd.f32 %v1287_v26, %v1263_v32 }
 0x5c1   :  { %v1333_v20 = vadd.f32 %v3364_v10, %v1311_v33 }
 0x5c2   :  { %v1233_v0 = vpop.permute.xlu0 %1232  ;;  %v1187_v23 = vpop.permute.xlu1 %1186 }
 0x5c3   :  { %v1260_v38 = vadd.f32 %v1233_v0, %v1212_v30  ;;  %v1213_v43 = vadd.f32 %v1187_v23, %v3265_v49  ;;  %v1345_v49 = vpack.c.bf16 %v1333_v20, %v1332_v52 }
 0x5c6   :  { %v1281_v2 = vpop.permute.xlu0 %1280  ;;  %v1235_v37 = vpop.permute.xlu1 %1234 }
 0x5c7   :  { %v1308_v36 = vadd.f32 %v1281_v2, %v1260_v38  ;;  %v1261_v50 = vadd.f32 %v1235_v37, %v1213_v43 }
 0x5c9   :  { %v1330_v13 = vadd.f32 %v3364_v10, %v1308_v36 }
 0x5ca   :  { %v1283_v41 = vpop.permute.xlu1 %1282  ;;  %v1197_v44 = vpop.permute.xlu0 %1196 }
 0x5cb   :  { %v1309_v47 = vadd.f32 %v1283_v41, %v1261_v50  ;;  %v1218_v60 = vadd.f32 %v1197_v44, %v3277_v4 }
 0x5cd   :  { %v1331_v11 = vadd.f32 %v3364_v10, %v1309_v47 }
 0x5ce   :  { %v1245_v53 = vpop.permute.xlu0 %1244  ;;  %v1199_v54 = vpop.permute.xlu1 %1198 }
 0x5cf   :  { %v1344_v62 = vpack.c.bf16 %v1331_v11, %v1330_v13  ;;  %v1219_v57 = vadd.f32 %v1199_v54, %v3285_v15  ;;  %v1266_v58 = vadd.f32 %v1245_v53, %v1218_v60  ;;  %v1989_v60 = vld [vmem:[#allocation10] ss:$0 sm:$0xff] }
 0x5d1   :  { %2161 = vmatprep.mubr.msk.bf16.mxu0 %vm895_vm1, %v1344_v62 }
 0x5d2   :  { %2162 = vmatmul.mubr.msk.bf16.gmra.mxu0 %vm895_vm1, %v1345_v49  ;;  %v1293_v63 = vpop.permute.xlu0 %1292  ;;  %v1247_v1 = vpop.permute.xlu1 %1246 }
 0x5d3   :  { %v1267_v6 = vadd.f32 %v1247_v1, %v1219_v57  ;;  %v1314_v12 = vadd.f32 %v1293_v63, %v1266_v58 }
 0x5d5   :  { %v1336_v17 = vadd.f32 %v3364_v10, %v1314_v12 }
 0x5d6   :  { %v1193_v3 = vpop.permute.xlu0 %1192  ;;  %v1295_v5 = vpop.permute.xlu1 %1294 }
 0x5d7   :  { %v1216_v59 = vadd.f32 %v1193_v3, %v3297_v29  ;;  %v1315_v61 = vadd.f32 %v1295_v5, %v1267_v6 }
 0x5d9   :  { %v1337_v15 = vadd.f32 %v3364_v10, %v1315_v61 }
 0x5da   :  { %v1241_v55 = vpop.permute.xlu0 %1240  ;;  %v1195_v56 = vpop.permute.xlu1 %1194 }
 0x5db   :  { %v1264_v28 = vadd.f32 %v1241_v55, %v1216_v59  ;;  %v1217_v9 = vadd.f32 %v1195_v56, %v3305_v18  ;;  %v1347_v18 = vpack.c.bf16 %v1337_v15, %v1336_v17 }
 0x5de   :  { %v1289_v51 = vpop.permute.xlu0 %1288  ;;  %v1243_v8 = vpop.permute.xlu1 %1242 }
 0x5df   :  { %v1312_v27 = vadd.f32 %v1289_v51, %v1264_v28  ;;  %v1265_v21 = vadd.f32 %v1243_v8, %v1217_v9 }
 0x5e1   :  { %v1334_v29 = vadd.f32 %v3364_v10, %v1312_v27 }
 0x5e2   :  { %v1291_v48 = vpop.permute.xlu1 %1290  ;;  %v1205_v39 = vpop.permute.xlu0 %1204 }
 0x5e3   :  { %v1313_v14 = vadd.f32 %v1291_v48, %v1265_v21  ;;  %v1222_v37 = vadd.f32 %v1205_v39, %v3317_v35 }
 0x5e5   :  { %v1335_v4 = vadd.f32 %v3364_v10, %v1313_v14 }
 0x5e6   :  { %v1253_v16 = vpop.permute.xlu0 %1252  ;;  %v1207_v19 = vpop.permute.xlu1 %1206 }
 0x5e7   :  { %v1346_v22 = vpack.c.bf16 %v1335_v4, %v1334_v29  ;;  %v1270_v36 = vadd.f32 %v1253_v16, %v1222_v37  ;;  %v1223_v50 = vadd.f32 %v1207_v19, %v3324_v40  ;;  %v295_v40 = vld [vmem:[%s3477_s11] sm:$0xf] }
 0x5e9   :  { %2165 = vmatprep.mubr.msk.bf16.mxu0 %vm895_vm1, %v1346_v22 }
 0x5ea   :  { %2166 = vmatmul.mubr.msk.bf16.gmra.mxu0 %vm895_vm1, %v1347_v18  ;;  %v1201_v24 = vpop.permute.xlu0 %1200  ;;  %v1255_v26 = vpop.permute.xlu1 %1254 }
 0x5eb   :  { %v1220_v25 = vadd.f32 %v1201_v24, %v3332_v31  ;;  %v1271_v41 = vadd.f32 %v1255_v26, %v1223_v50 }
 0x5ee   :  { %v1249_v0 = vpop.permute.xlu0 %1248  ;;  %v1203_v23 = vpop.permute.xlu1 %1202 }
 0x5ef   :  { %v1268_v32 = vadd.f32 %v1249_v0, %v1220_v25  ;;  %v1221_v2 = vadd.f32 %v1203_v23, %v3340_v45 }
 0x5f2   :  { %v1297_v30 = vpop.permute.xlu0 %1296  ;;  %v1251_v7 = vpop.permute.xlu1 %1250 }
 0x5f3   :  { %v1316_v38 = vadd.f32 %v1297_v30, %v1268_v32  ;;  %v1269_v43 = vadd.f32 %v1251_v7, %v1221_v2 }
 0x5f5   :  { %v1338_v44 = vadd.f32 %v3364_v10, %v1316_v38 }
 0x5f6   :  { %v1301_v42 = vpop.permute.xlu0 %1300  ;;  %v1299_v33 = vpop.permute.xlu1 %1298 }
 0x5f7   :  { %v1317_v34 = vadd.f32 %v1299_v33, %v1269_v43  ;;  %v1318_v47 = vadd.f32 %v1301_v42, %v1270_v36 }
 0x5f9   :  { %v1339_v31 = vadd.f32 %v3364_v10, %v1317_v34  ;;  %v1340_v45 = vadd.f32 %v3364_v10, %v1318_v47 }
 0x5fa   :  { %v1303_v20 = vpop.permute.xlu1 %1302 }
 0x5fb   :  { %v1348_v13 = vpack.c.bf16 %v1339_v31, %v1338_v44  ;;  %v1319_v11 = vadd.f32 %v1303_v20, %v1271_v41 }
 0x5fd   :  { %v1341_v35 = vadd.f32 %v3364_v10, %v1319_v11  ;;  %2169 = vmatprep.mubr.msk.bf16.mxu0 %vm895_vm1, %v1348_v13 }
 0x5ff   :  { %v1349_v52 = vpack.c.bf16 %v1341_v35, %v1340_v45  ;;  %v2000_v35 = vld [vmem:[#allocation13] ss:$0 sm:$0xff] }
 0x601   :  { %2170 = vmatmul.mubr.msk.bf16.gmra.mxu0 %vm895_vm1, %v1349_v52 }
 0x602   :  { %2195 = vmatprep.mubr.msk.bf16.mxu0 %vm2635_vm2, %v2634_v46 }
 0x609   :  { %2196 = vmatmul.mubr.msk.bf16.vlgmr.msra.gmra.mxu0 %vm372_vm0, %v295_v40 }
 0x60a   :  { %2211 = vmatprep.mubr.msk.bf16.mxu0 %vm2635_vm2, %v2634_v46 }
 0x67a   :  { %v2159_v53 = vpop.f32.mrf.mxu0 }
 0x67b   :  { %v1435_v50 = vadd.f32 %v2159_v53, %v1989_v60  ;;  %v294_v53 = vld [vmem:[%s3476_s10] sm:$0xf] }
 0x67c   :  { %v3411_v54 = vpop.f32.mrf.mxu0 }
 0x67d   :  { %v1491_v31 = vmax.f32 %v1435_v50, 0.0  ;;  %v1427_v20 = vadd.f32 %v1989_v60, %v3411_v54  ;;  %v2288_v54 = vld [vmem:[%s3480_s14 + $0x8] sm:$0xff]  }
 0x67e   :  { %v2160_v10 = vpop.f32.mrf.mxu0 }
 0x67f   :  { %v1438_v42 = vadd.f32 %v2160_v10, %v1989_v60  ;;  %v1489_v45 = vmax.f32 %v1427_v20, 0.0 }
 0x680   :  { %v1429_v62 = vpop.f32.mrf.mxu0 }
 0x681   :  { %v1492_v41 = vmax.f32 %v1438_v42, 0.0  ;;  %v1430_v44 = vadd.f32 %v1989_v60, %v1429_v62  ;;  %v2289_v62 = vld [vmem:[%s3480_s14] sm:$0xff]  }
 0x683   :  { %v1506_v13 = vpack.c.bf16 %v1492_v41, %v1491_v31  ;;  %v1490_v11 = vmax.f32 %v1430_v44, 0.0 }
 0x685   :  { %v1505_v52 = vpack.c.bf16 %v1490_v11, %v1489_v45 }
 0x692   :  { %v2163_v49 = vpop.f32.mrf.mxu0 }
 0x693   :  { %v1451_v30 = vadd.f32 %v2163_v49, %v1989_v60 }
 0x694   :  { %v1442_v63 = vpop.f32.mrf.mxu0 }
 0x695   :  { %v1495_v38 = vmax.f32 %v1451_v30, 0.0  ;;  %v1443_v43 = vadd.f32 %v1989_v60, %v1442_v63  ;;  %v2290_v63 = vld [vmem:[%s3482_s16 + $0x8] sm:$0xff]  }
 0x696   :  { %v2164_v1 = vpop.f32.mrf.mxu0  ;;  %2208 = vmatpush3.bf16.msra.mxu0 %v2290_v63 }
 0x697   :  { %v1454_v0 = vadd.f32 %v2164_v1, %v1989_v60  ;;  %v1493_v34 = vmax.f32 %v1443_v43, 0.0  ;;  %2209 = vmatprep.subr.bf16.mxu0 %v2634_v46  ;;  %v2291_v1 = vld [vmem:[%s3482_s16] sm:$0xff]   ;;  %s2636_s16 = smov 8  }
 0x698   :  { %v1445_v3 = vpop.f32.mrf.mxu0 }
 0x699   :  { %v1496_v32 = vmax.f32 %v1454_v0, 0.0  ;;  %v1446_v2 = vadd.f32 %v1989_v60, %v1445_v3 }
 0x69a   :  { %2210 = vmatpush3.bf16.msra.mxu0 %v2291_v1 }
 0x69b   :  { %v1508_v33 = vpack.c.bf16 %v1496_v32, %v1495_v38  ;;  %v1494_v36 = vmax.f32 %v1446_v2, 0.0  ;;  %2221 = vmatprep.subr.bf16.mxu0 %v2634_v46  ;;  %v2296_v32 = vld [vmem:[#allocation22] sm:$0xff]   ;;  %v2014_v2 = vld [vmem:[#allocation20] ss:$0 sm:$0xff] }
 0x69d   :  { %v1507_v47 = vpack.c.bf16 %v1494_v36, %v1493_v34  ;;  %v2018_v34 = vld [vmem:[#allocation23] ss:$0 sm:$0xff] }
 0x6aa   :  { %v2167_v5 = vpop.f32.mrf.mxu0 }
 0x6ab   :  { %v1467_v29 = vadd.f32 %v2167_v5, %v1989_v60 }
 0x6ac   :  { %v1458_v55 = vpop.f32.mrf.mxu0 }
 0x6ad   :  { %v1499_v24 = vmax.f32 %v1467_v29, 0.0  ;;  %v1459_v26 = vadd.f32 %v1989_v60, %v1458_v55 }
 0x6ae   :  { %v2168_v56 = vpop.f32.mrf.mxu0 }
 0x6af   :  { %v1470_v48 = vadd.f32 %v2168_v56, %v1989_v60  ;;  %v1497_v7 = vmax.f32 %v1459_v26, 0.0 }
 0x6b0   :  { %v1461_v57 = vpop.f32.mrf.mxu0 }
 0x6b1   :  { %v1500_v16 = vmax.f32 %v1470_v48, 0.0  ;;  %v1462_v19 = vadd.f32 %v1989_v60, %v1461_v57  ;;  %v2003_v57 = vld [vmem:[#allocation14] ss:$0 sm:$0xff] }
 0x6b3   :  { %v1510_v23 = vpack.c.bf16 %v1500_v16, %v1499_v24  ;;  %v1498_v25 = vmax.f32 %v1462_v19, 0.0  ;;  %v2293_v16 = vld [vmem:[%s3486_s20 + $0x8] sm:$0xff]   ;;  %v2294_v19 = vld [vmem:[%s3486_s20] sm:$0xff]   ;;  %s2637_s20 = smov [#allocation25]  }
 0x6b4   :  { %s1931_s1 = sshll.u32 %s2637_s20, 4  ;;  %s1932_s1 = int_to_ptr.vmem [resolvable:$true] %s1931_s1 }
 0x6b5   :  { %v1509_v37 = vpack.c.bf16 %v1498_v25, %v1497_v7  ;;  %v2295_v7 = vld [vmem:[#allocation22 + $0x8] sm:$0xff]   ;;  %s2577_s12 = scalar_lea.vmem %s1932_s1, 128  ;;  %p2582_p1 = scmp.lt.s32.totalorder %s1932_s1, %s1932_s1 }
 0x6b6   :  { %p2578_p0 = scmp.ne.s32.totalorder %s1932_s1, %s2577_s12  ;;  %p2583_p2 = scmp.lt.s32.totalorder %s2577_s12, %s2577_s12 }
 0x6b8   :  { %p2584_p3 = por %p2583_p2, %p2582_p1 }
 0x6ba   :  { %p2585_p4 = pnand %p2584_p3, %p2578_p0 }
 0x6c1   :  { %v2171_v59 = vpop.f32.mrf.mxu0 }
 0x6c2   :  { %v1483_v51 = vadd.f32 %v2171_v59, %v1989_v60 }
 0x6c3   :  { %v1474_v6 = vpop.f32.mrf.mxu0 }
 0x6c4   :  { %v1503_v58 = vmax.f32 %v1483_v51, 0.0  ;;  %v1475_v61 = vadd.f32 %v1989_v60, %v1474_v6 }
 0x6c5   :  { %v2172_v8 = vpop.f32.mrf.mxu0 }
 0x6c6   :  { %v1486_v28 = vadd.f32 %v2172_v8, %v1989_v60  ;;  %v1501_v4 = vmax.f32 %v1475_v61, 0.0  ;;  %v2007_v61 = vld [vmem:[#allocation16] ss:$0 sm:$0xff] }
 0x6c7   :  { %v1477_v9 = vpop.f32.mrf.mxu0 }
 0x6c8   :  { %v1504_v27 = vmax.f32 %v1486_v28, 0.0  ;;  %v1478_v21 = vadd.f32 %v1989_v60, %v1477_v9 }
 0x6c9   :  { %v1602_v12 = vpop.f32.mrf.mxu0 }
 0x6ca   :  { %v1512_v39 = vpack.c.bf16 %v1504_v27, %v1503_v58  ;;  %v1502_v14 = vmax.f32 %v1478_v21, 0.0  ;;  %v1603_v40 = vadd.f32 %v2000_v35, %v1602_v12  ;;  %v2292_v58 = vld [vmem:[#allocation17] sm:$0xff]  }
 0x6cb   :  { %v2197_v15 = vpop.f32.mrf.mxu0 }
 0x6cc   :  { %2174 = vmatpush3.bf16.msra.mxu1 %v1512_v39  ;;  %v1511_v22 = vpack.c.bf16 %v1502_v14, %v1501_v4  ;;  %v1608_v10 = vmax.f32 %v1603_v40, 0.0 }
 0x6cd   :  { %2175 = vmatprep.subr.bf16.mxu1 %v2634_v46  ;;  %v1605_v17 = vpop.f32.mrf.mxu0 }
 0x6ce   :  { %v1609_v49 = vpack.c.bf16 %v1608_v10, %v1608_v10 }
 0x6cf   :  { %v2198_v18 = vpop.f32.mrf.mxu0 }
 0x6d0   :  { %2176 = vmatpush3.bf16.msra.mxu1 %v1511_v22  ;;  %v2011_v22 = vld [vmem:[#allocation19] ss:$0 sm:$0xff] }
 0x6d1   :  { %2177 = vmatprep.subr.bf16.mxu1 %v2634_v46 }
 0x6d4   :  { %2178 = vmatpush3.bf16.msra.mxu1 %v1510_v23 }
 0x6d5   :  { %2179 = vmatprep.subr.bf16.mxu1 %v2634_v46 }
 0x6d8   :  { %2180 = vmatpush3.bf16.msra.mxu1 %v1509_v37 }
 0x6d9   :  { %2181 = vmatprep.subr.bf16.mxu1 %v2634_v46 }
 0x6dc   :  { %2182 = vmatpush3.bf16.msra.mxu1 %v1508_v33 }
 0x6dd   :  { %2183 = vmatprep.subr.bf16.mxu1 %v2634_v46 }
 0x6e0   :  { %2184 = vmatpush3.bf16.msra.mxu1 %v1507_v47 }
 0x6e1   :  { %2185 = vmatprep.subr.bf16.mxu1 %v2634_v46 }
 0x6e4   :  { %2186 = vmatpush3.bf16.msra.mxu1 %v1506_v13 }
 0x6e5   :  { %2187 = vmatprep.subr.bf16.mxu1 %v2634_v46 }
 0x6e8   :  { %2188 = vmatpush3.bf16.msra.mxu1 %v1505_v52 }
 0x6e9   :  { %2199 = vmatprep.subr.bf16.mxu1 %v2634_v46 }
 0x6eb   :  { %2190 = vmatmul.mubr.bf16.vlgmr.msra.gmra.mxu1 %v294_v53 }
 0x6ec   :  { %2200 = vmatpush3.bf16.msra.mxu1 %v2288_v54  ;;  %2203 = vmatprep.mubr.msk.bf16.mxu1 %vm2635_vm2, %v2634_v46 }
 0x6ed   :  { %2201 = vmatprep.subr.bf16.mxu1 %v2634_v46 }
 0x6f0   :  { %2202 = vmatpush3.bf16.msra.mxu1 %v2289_v62 }
 0x6f1   :  { %2215 = vmatprep.subr.bf16.mxu1 %v2634_v46 }
 0x6f3   :  { %2204 = vmatmul.mubr.msk.bf16.vlgmr.msra.gmra.mxu1 %vm895_vm1, %v1609_v49 }
 0x6f4   :  { %2217 = vmatprep.mubr.msk.bf16.mxu1 %vm2635_vm2, %v2634_v46  ;;  %2216 = vmatpush3.bf16.msra.mxu1 %v2292_v58 }
 0x6f5   :  { %2229 = vmatprep.subr.bf16.mxu1 %v2634_v46 }
 0x7ab   :  { %v1547_v3 = vpop.f32.mrf.mxu1 }
 0x7ac   :  { %v1736_v29 = vpack.c.bf16 %v1547_v3, %v1547_v3 }
 0x7ad   :  { %v2191_v5 = vpop.f32.mrf.mxu1 }
 0x7af   :  { %v1550_v55 = vpop.f32.mrf.mxu1 }
 0x7b1   :  { %v2192_v56 = vpop.f32.mrf.mxu1 }
 0x7b3   :  { %v1665_v59 = vpop.f32.mrf.mxu1 }
 0x7b4   :  { %v1666_v60 = vadd.f32 %v2003_v57, %v1665_v59 }
 0x7b5   :  { %v2205_v6 = vpop.f32.mrf.mxu1 }
 0x7b6   :  { %v1671_v51 = vmax.f32 %v1666_v60, 0.0 }
 0x7b7   :  { %v1668_v8 = vpop.f32.mrf.mxu1 }
 0x7b8   :  { %v1672_v28 = vpack.c.bf16 %v1671_v51, %v1671_v51 }
 0x7b9   :  { %v2206_v9 = vpop.f32.mrf.mxu1 }
 0x7ba   :  { %2212 = vmatmul.mubr.msk.bf16.vlgmr.msra.gmra.mxu0 %vm895_vm1, %v1672_v28 }
 0x7bb   :  { %2225 = vmatprep.mubr.msk.bf16.mxu0 %vm2635_vm2, %v2634_v46  ;;  %2222 = vmatpush3.bf16.msra.mxu0 %v2293_v16 }
 0x7bc   :  { %2223 = vmatprep.subr.bf16.mxu0 %v2634_v46 }
 0x7bf   :  { %2224 = vmatpush3.bf16.msra.mxu0 %v2294_v19 }
 0x87a   :  { %v1728_v27 = vpop.f32.mrf.mxu0 }
 0x87b   :  { %v1729_v21 = vadd.f32 %v2007_v61, %v1728_v27 }
 0x87c   :  { %v2213_v12 = vpop.f32.mrf.mxu0 }
 0x87d   :  { %v1734_v48 = vmax.f32 %v1729_v21, 0.0 }
 0x87e   :  { %v1731_v39 = vpop.f32.mrf.mxu0 }
 0x87f   :  { %v1735_v14 = vpack.c.bf16 %v1734_v48, %v1734_v48 }
 0x880   :  { %v2214_v15 = vpop.f32.mrf.mxu0 }
 0x881   :  { %1738 = vrot.lane.b32.xlu0 %v1735_v14, %s2636_s16 }
 0x8f3   :  { %v1739_v4 = vpop.permute.xlu0 %1738 }
 0x8f4   :  { %v1743_v17 = vsel %vm1740_vm3, %v1736_v29, %v1739_v4 }
 0x8f5   :  { %2218 = vmatmul.mubr.msk.bf16.vlgmr.msra.gmra.mxu1 %vm372_vm0, %v1743_v17 }
 0x8f6   :  { %2233 = vmatprep.mubr.msk.bf16.mxu1 %vm2635_vm2, %v2634_v46  ;;  %2230 = vmatpush3.bf16.msra.mxu1 %v2295_v7 }
 0x8f7   :  { %2231 = vmatprep.subr.bf16.mxu1 %v2634_v46 }
 0x8fa   :  { %2232 = vmatpush3.bf16.msra.mxu1 %v2296_v32 }
 0x9b5   :  { %v1792_v18 = vpop.f32.mrf.mxu1 }
 0x9b6   :  { %v1793_v24 = vadd.f32 %v2011_v22, %v1792_v18 }
 0x9b7   :  { %v2219_v26 = vpop.f32.mrf.mxu1 }
 0x9b8   :  { %v1798_v0 = vmax.f32 %v1793_v24, 0.0 }
 0x9b9   :  { %v1795_v23 = vpop.f32.mrf.mxu1 }
 0x9ba   :  { %v1799_v25 = vpack.c.bf16 %v1798_v0, %v1798_v0 }
 0x9bb   :  { %v2220_v30 = vpop.f32.mrf.mxu1 }
 0x9bc   :  { %2226 = vmatmul.mubr.msk.bf16.vlgmr.msra.gmra.mxu0 %vm895_vm1, %v1799_v25 }
 0xa7c   :  { %v1855_v37 = vpop.f32.mrf.mxu0 }
 0xa7d   :  { %v1856_v38 = vadd.f32 %v2014_v2, %v1855_v37 }
 0xa7e   :  { %v2227_v43 = vpop.f32.mrf.mxu0 }
 0xa7f   :  { %v1861_v42 = vmax.f32 %v1856_v38, 0.0 }
 0xa80   :  { %v1858_v33 = vpop.f32.mrf.mxu0 }
 0xa81   :  { %v1862_v36 = vpack.c.bf16 %v1861_v42, %v1861_v42 }
 0xa82   :  { %v2228_v50 = vpop.f32.mrf.mxu0 }
 0xa83   :  { %2234 = vmatmul.mubr.msk.bf16.vlgmr.msra.gmra.mxu1 %vm895_vm1, %v1862_v36 }
 0xb43   :  { %v1918_v41 = vpop.f32.mrf.mxu1 }
 0xb44   :  { %v1919_v44 = vadd.f32 %v2018_v34, %v1918_v41 }
 0xb45   :  { %v2235_v47 = vpop.f32.mrf.mxu1 }
 0xb46   :  { %1924 = vst [vmem:[#allocation25] sm:$0xff] %v1919_v44 }
 0xb47   :  { %v1921_v46 = vpop.f32.mrf.mxu1 }
 0xb48   :  { %2588 = shalt.err (!%p2585_p4)
}
 0xb49   :  { %1934 = dma.vmem_to_hbm [thread:$0]  %s1932_s1, 128, %s3490_s24, [#allocation4]   ;;  %v2236_v31 = vpop.f32.mrf.mxu1 }
 0xb4a   :  { %2613 = dma.done.wait [#allocation4], 128  }
 0xb4b   :  { %2614 = vsyncadd [#allocation4], 4294967168 }
 0xb4c   :  { %1938 = vsyncpa [#allocation3], 1 }
 0xb4d   :  { %1939 = vsyncpa [#allocation6], 1 }
 0xb4e   :  { %1940 = vsyncpa [#allocation9], 1 }
 0xb4f   :  { %1941 = vsyncpa [#allocation12], 1 }
 0xb50   :  { %1942 = vsyncpa [#allocation15], 1 }
 0xb51   :  { %1943 = vsyncpa [#allocation18], 1 }
 0xb52   :  { %1944 = vsyncpa [#allocation21], 1 }
 0xb53   :  { %1945 = vsyncpa [#allocation24], 1 }
 0xb54   :  { %1946 = vsyncpa [#allocation4], 1 }

</bundles_post_ra>
